<compile_context>
chip_gen: v7x
topology: tpu7x:2x2x1
jax: 0.10.0
libtpu: 0.0.40
codegen_flags: <defaults>
</compile_context>

<pallas_src>
import functools

import jax
import jax.numpy as jnp
from jax import lax
from jax.experimental import pallas as pl
from jax.experimental.pallas import tpu as pltpu


def _round_up(x, m):
    return (x + m - 1) // m * m


# --------------------------------------------------------------------------- #
# Fused VAE kernel
# --------------------------------------------------------------------------- #

def _vae_kernel(x_ref, eps_ref, w_ref, b_ref,              # inputs
                mlv_ref, xr_ref,                            # outputs
                hcv, zcv, pk,                               # VMEM scratch
                *, Wp, W, span, span_pad, c0, n_out,
                cin, zc, zc_p, cmid,
                r_enc1, r_enc2, r_dec1, r_dec2, n_enc2, n_dec2):
    # ---- targeted scratch init (every step; never program_id-gated) --------
    hcv[:, 0:c0] = jnp.zeros((hcv.shape[0], c0), hcv.dtype)                  # top halo
    hcv[:, c0 + n_out:] = jnp.zeros(
        (hcv.shape[0], hcv.shape[1] - c0 - n_out), hcv.dtype)                # tail
    zcv[...] = jnp.zeros_like(zcv)   # small; padded channel rows must be finite/0

    # ---- real-pixel mask over the n_out output lanes (built once per step) --
    pos = lax.broadcasted_iota(jnp.int32, (1, n_out), 1)
    q = pos % span_pad                      # position inside one image slab
    col = q % Wp                            # padded-row column (0 / W+1 = gutters)
    valid = (q < span) & (col >= 1) & (col <= W)

    def conv3x3(src_ref, w_row0, w_rows, k):
        """3x3 SAME conv: 9 shifted slices packed into the contraction dim,
        then a single (w_rows, k) @ (k, n_out) MXU matmul (f32 accumulate)."""
        rows = src_ref.shape[0]
        for dy in range(3):
            for dx in range(3):
                t = 3 * dy + dx
                off = c0 + (dy - 1) * Wp + (dx - 1)
                pk[t * rows:(t + 1) * rows, :] = src_ref[:, off:off + n_out]
        return jnp.dot(w_ref[w_row0:w_row0 + w_rows, 0:k], pk[0:k, :],
                       preferred_element_type=jnp.float32)

    # ------------------------------ encoder ---------------------------------
    h = conv3x3(x_ref, r_enc1, cmid, 9 * x_ref.shape[0])
    h = jnp.maximum(h + b_ref[r_enc1:r_enc1 + cmid, :], 0.0)
    hcv[:, c0:c0 + n_out] = jnp.where(valid, h, 0.0).astype(hcv.dtype)

    mlv = conv3x3(hcv, r_enc2, n_enc2, 9 * cmid)[:2 * zc, :]
    mlv = mlv + b_ref[r_enc2:r_enc2 + 2 * zc, :]
    mlv_ref[...] = mlv.astype(mlv_ref.dtype)          # mu | logvar (== chunk(2, dim=1))

    # -------------------------- reparameterize ------------------------------
    mu = mlv[:zc, :]
    logvar = mlv[zc:2 * zc, :]
    z = mu + jnp.exp(0.5 * logvar) * eps_ref[...]      # f32 elementwise; exp -> EUP
    zcv[0:zc, c0:c0 + n_out] = jnp.where(valid, z, 0.0).astype(zcv.dtype)

    # ------------------------------ decoder ---------------------------------
    h2 = conv3x3(zcv, r_dec1, cmid, 9 * zc_p)
    h2 = jnp.maximum(h2 + b_ref[r_dec1:r_dec1 + cmid, :], 0.0)
    hcv[:, c0:c0 + n_out] = jnp.where(valid, h2, 0.0).astype(hcv.dtype)

    xr = conv3x3(hcv, r_dec2, n_dec2, 9 * cmid)[:cin, :]
    xr_ref[...] = (xr + b_ref[r_dec2:r_dec2 + cin, :]).astype(xr_ref.dtype)


# --------------------------------------------------------------------------- #
# Host-side layout / parameter packing
# --------------------------------------------------------------------------- #

def _tap_matrix(w_hwio, cin_pad):
    """(3,3,Cin,Cout) f32 -> (Cout, 9*cin_pad); column = (3*dy+dx)*cin_pad + ci,
    matching the tap-packed scratch layout built inside the kernel."""
    kh, kw, ci, co = w_hwio.shape
    w = jnp.pad(w_hwio, ((0, 0), (0, 0), (0, cin_pad - ci), (0, 0)))
    return jnp.transpose(w, (3, 0, 1, 2)).reshape(co, kh * kw * cin_pad)


def _to_slabs(t, c_pad, G, b_tile, span, span_pad, lead, tail, dtype):
    """(N,C,H,W) -> (G, c_pad, lead + b_tile*span_pad + tail) canvas layout.

    Per image: rows flattened with a 1-column zero gutter on each side
    (row stride W+2), zero-padded up to span_pad (>= span + W+2) which doubles
    as the bottom halo / next image's top halo."""
    n, c, H, W = t.shape
    t = jnp.pad(t, ((0, 0), (0, c_pad - c), (0, 0), (1, 1)))
    t = t.reshape(n, c_pad, span)
    t = jnp.pad(t, ((0, 0), (0, 0), (0, span_pad - span)))
    t = t.reshape(G, b_tile, c_pad, span_pad).transpose(0, 2, 1, 3)
    t = t.reshape(G, c_pad, b_tile * span_pad)
    if lead or tail:
        t = jnp.pad(t, ((0, 0), (0, 0), (lead, tail)))
    return t.astype(dtype)


def vae_forward(params, x_nchw, eps_nchw, *, z_channels=3, num_channels=32,
                batch_tile=None):
    """x, eps in NCHW; returns (x_recon, mu, logvar) in NCHW (like the module)."""
    n, cin, H, W = x_nchw.shape
    zc, cmid = z_channels, num_channels
    cin_p = _round_up(cin, 16)       # bf16 sublane-pack granularity
    zc_p = _round_up(zc, 16)

    # flattened, gutter-padded spatial layout
    Wp = W + 2
    span = H * Wp                                   # real slab (incl. L/R gutters)
    span_pad = _round_up(span + Wp, 128)            # + bottom halo, lane-dense
    c0 = _round_up(Wp + 1, 128)                     # leading zeros (top halo)
    tail = _round_up(Wp + 1, 128)                   # room for the last dy=+1 reads

    # batch tile: widen the MXU N dim, but keep >= 2 grid steps (v7x: 2 TCs)
    if batch_tile is None:
        batch_tile = 1
        for bt in range(n, 0, -1):
            if n % bt:
                continue
            if n // bt < min(2, n):
                continue
            if bt * span_pad > 4096:
                continue
            batch_tile = bt
            break
    assert n % batch_tile == 0
    G = n // batch_tile
    n_out = batch_tile * span_pad
    Lb = c0 + n_out + tail

    # pack all conv params into one weight blob + one bias blob (16-row segments)
    k_max = 9 * max(cmid, cin_p, zc_p)
    r_enc1 = 0
    r_enc2 = r_enc1 + _round_up(cmid, 16)
    n_enc2 = _round_up(2 * zc, 16)
    r_dec1 = r_enc2 + n_enc2
    r_dec2 = r_dec1 + _round_up(cmid, 16)
    n_dec2 = _round_up(cin, 16)
    n_rows = r_dec2 + n_dec2

    w_blob = jnp.zeros((n_rows, k_max), jnp.float32)
    b_blob = jnp.zeros((n_rows, 1), jnp.float32)

    def _put(wb, bb, row, w_hwio, b, cin_pad):
        tw = _tap_matrix(w_hwio, cin_pad)
        wb = wb.at[row:row + tw.shape[0], :tw.shape[1]].set(tw)
        bb = bb.at[row:row + b.shape[0], 0].set(b.astype(jnp.float32))
        return wb, bb

    w_blob, b_blob = _put(w_blob, b_blob, r_enc1, params["enc_w1"], params["enc_b1"], cin_p)
    w_blob, b_blob = _put(w_blob, b_blob, r_enc2, params["enc_w2"], params["enc_b2"], cmid)
    w_blob, b_blob = _put(w_blob, b_blob, r_dec1, params["dec_w1"], params["dec_b1"], zc_p)
    w_blob, b_blob = _put(w_blob, b_blob, r_dec2, params["dec_w2"], params["dec_b2"], cmid)
    w_blob = w_blob.astype(jnp.bfloat16)

    # inputs in the canvas layout (x also provides all of its own halo zeros)
    x_in = _to_slabs(x_nchw, cin_p, G, batch_tile, span, span_pad,
                     c0, tail, jnp.bfloat16)                        # (G, cin_p, Lb)
    eps_in = _to_slabs(eps_nchw, zc, G, batch_tile, span, span_pad,
                       0, 0, jnp.float32)                           # (G, zc, n_out)

    kern = functools.partial(
        _vae_kernel, Wp=Wp, W=W, span=span, span_pad=span_pad, c0=c0,
        n_out=n_out, cin=cin, zc=zc, zc_p=zc_p, cmid=cmid,
        r_enc1=r_enc1, r_enc2=r_enc2, r_dec1=r_dec1, r_dec2=r_dec2,
        n_enc2=n_enc2, n_dec2=n_dec2)

    per_step = lambda c, L: pl.BlockSpec((None, c, L), lambda g: (g, 0, 0))
    full = lambda shp: pl.BlockSpec(shp, lambda g: (0,) * len(shp))

    mlv, x_rec = pl.pallas_call(
        kern,
        out_shape=(jax.ShapeDtypeStruct((G, 2 * zc, n_out), jnp.float32),
                   jax.ShapeDtypeStruct((G, cin, n_out), jnp.float32)),
        grid=(G,),
        in_specs=[per_step(cin_p, Lb),
                  per_step(zc, n_out),
                  full(w_blob.shape),
                  full(b_blob.shape)],
        out_specs=(per_step(2 * zc, n_out), per_step(cin, n_out)),
        scratch_shapes=[pltpu.VMEM((cmid, Lb), jnp.bfloat16),        # h canvas
                        pltpu.VMEM((zc_p, Lb), jnp.bfloat16),        # z canvas
                        pltpu.VMEM((k_max, n_out), jnp.bfloat16)],   # tap-packed K
        compiler_params=pltpu.CompilerParams(
            dimension_semantics=("parallel",),
            vmem_limit_bytes=32 * 1024 * 1024),
    )(x_in, eps_in, w_blob, b_blob)

    # strip gutters / padding back to NCHW
    def _unpack(t):
        c = t.shape[1]
        t = t.reshape(G, c, batch_tile, span_pad).transpose(0, 2, 1, 3)
        t = t.reshape(n, c, span_pad)[:, :, :span].reshape(n, c, H, Wp)
        return t[:, :, :, 1:W + 1]

    mlv = _unpack(mlv)
    x_recon = _unpack(x_rec)
    return x_recon, mlv[:, :zc], mlv[:, zc:]


# --------------------------------------------------------------------------- #
# Parameters + pure-JAX reference
# --------------------------------------------------------------------------- #

def init_params(key, img_channels=3, z_channels=3, num_channels=32):
    ks = jax.random.split(key, 8)

    def conv_init(kw_, kb_, cin, cout):
        fan_in = 9 * cin
        w = jax.random.normal(kw_, (3, 3, cin, cout), jnp.float32) / jnp.sqrt(fan_in)
        b = 0.1 * jax.random.normal(kb_, (cout,), jnp.float32)
        return w, b

    enc_w1, enc_b1 = conv_init(ks[0], ks[1], img_channels, num_channels)
    enc_w2, enc_b2 = conv_init(ks[2], ks[3], num_channels, 2 * z_channels)
    dec_w1, dec_b1 = conv_init(ks[4], ks[5], z_channels, num_channels)
    dec_w2, dec_b2 = conv_init(ks[6], ks[7], num_channels, img_channels)
    return dict(enc_w1=enc_w1, enc_b1=enc_b1, enc_w2=enc_w2, enc_b2=enc_b2,
                dec_w1=dec_w1, dec_b1=dec_b1, dec_w2=dec_w2, dec_b2=dec_b2)


def _conv_ref(x, w_hwio, b):
    w_oihw = jnp.transpose(w_hwio, (3, 2, 0, 1))
    y = jax.lax.conv_general_dilated(
        x, w_oihw, window_strides=(1, 1), padding="SAME",
        dimension_numbers=("NCHW", "OIHW", "NCHW"),
        precision=jax.lax.Precision.HIGHEST)
    return y + b[None, :, None, None]


def vae_forward_ref(params, x, eps):
    h = jnp.maximum(_conv_ref(x, params["enc_w1"], params["enc_b1"]), 0.0)
    enc = _conv_ref(h, params["enc_w2"], params["enc_b2"])
    zc = enc.shape[1] // 2
    mu, logvar = enc[:, :zc], enc[:, zc:]
    z = mu + jnp.exp(0.5 * logvar) * eps
    hd = jnp.maximum(_conv_ref(z, params["dec_w1"], params["dec_b1"]), 0.0)
    x_recon = _conv_ref(hd, params["dec_w2"], params["dec_b2"])
    return x_recon, mu, logvar


if __name__ == "__main__":
    key = jax.random.PRNGKey(0)
    k_param, k_x, k_eps = jax.random.split(key, 3)

    img_channels, z_channels, num_channels = 3, 3, 32
    params = init_params(k_param, img_channels, z_channels, num_channels)

    x = jax.random.normal(k_x, (2, img_channels, 16, 16), jnp.float32)    # NCHW
    eps = jax.random.normal(k_eps, (2, z_channels, 16, 16), jnp.float32)

    fwd = jax.jit(functools.partial(vae_forward, z_channels=z_channels,
                                    num_channels=num_channels))
    x_recon, mu, logvar = fwd(params, x, eps)
    jax.block_until_ready((x_recon, mu, logvar))

    assert x_recon.shape == (2, img_channels, 16, 16)
    assert mu.shape == (2, z_channels, 16, 16)
    assert logvar.shape == (2, z_channels, 16, 16)

    # correctness vs a pure-JAX reference (bf16 MXU inputs -> loose tolerance,
    # intentional: activations/weights are fed to the MXU in bf16)
    xr_r, mu_r, lv_r = vae_forward_ref(params, x, eps)
    for got, ref in ((mu, mu_r), (logvar, lv_r), (x_recon, xr_r)):
        err = float(jnp.max(jnp.abs(got - ref)))
        assert err < 1e-1, f"max abs err {err}"

    print("KERNEL_OK")
</pallas_src>

<mosaic_0001>
module attributes {stable_mosaic.version = 11 : i64} {
  func.func @_vae_kernel(%arg0: i32, %arg1: memref<1x16x640xbf16, #tpu.memory_space<vmem>>, %arg2: memref<1x3x384xf32, #tpu.memory_space<vmem>>, %arg3: memref<96x288xbf16, #tpu.memory_space<vmem>>, %arg4: memref<96x1xf32, #tpu.memory_space<vmem>>, %arg5: memref<1x6x384xf32, #tpu.memory_space<vmem>>, %arg6: memref<1x3x384xf32, #tpu.memory_space<vmem>>, %arg7: memref<32x640xbf16, #tpu.memory_space<vmem>>, %arg8: memref<16x640xbf16, #tpu.memory_space<vmem>>, %arg9: memref<288x384xbf16, #tpu.memory_space<vmem>>) attributes {dimension_semantics = [#tpu.dimension_semantics<parallel>], iteration_bounds = array<i64: 2>, scalar_prefetch = 0 : i64, scratch_operands = 3 : i64, tpu.core_type = #tpu.core_type<tc>, window_params = [{transform_indices = @transform_0, window_bounds = array<i64: 1, 16, 640>}, {transform_indices = @transform_1, window_bounds = array<i64: 1, 3, 384>}, {pipeline_mode = #tpu.pipeline_mode<synchronous>, transform_indices = @transform_2, window_bounds = array<i64: 96, 288>}, {pipeline_mode = #tpu.pipeline_mode<synchronous>, transform_indices = @transform_3, window_bounds = array<i64: 96, 1>}, {transform_indices = @transform_4, window_bounds = array<i64: 1, 6, 384>}, {transform_indices = @transform_5, window_bounds = array<i64: 1, 3, 384>}]} {
    %cst = arith.constant 0.000000e+00 : bf16
    %0 = vector.broadcast %cst : bf16 to vector<32x128xbf16>
    %c0 = arith.constant 0 : index
    %c0_0 = arith.constant 0 : index
    %1 = vector.load %arg7[%c0, %c0_0] : memref<32x640xbf16, #tpu.memory_space<vmem>>, vector<32x128xbf16>
    tpu.vector_store %arg7[%c0, %c0_0], %0 {strides = array<i32>} : memref<32x640xbf16, #tpu.memory_space<vmem>>, vector<32x128xbf16>,
    %cst_1 = arith.constant 0.000000e+00 : bf16
    %2 = vector.broadcast %cst_1 : bf16 to vector<32x128xbf16>
    %c0_2 = arith.constant 0 : index
    %c512 = arith.constant 512 : index
    %3 = vector.load %arg7[%c0_2, %c512] : memref<32x640xbf16, #tpu.memory_space<vmem>>, vector<32x128xbf16>
    tpu.vector_store %arg7[%c0_2, %c512], %2 {strides = array<i32>} : memref<32x640xbf16, #tpu.memory_space<vmem>>, vector<32x128xbf16>,
    %cst_3 = arith.constant 0.000000e+00 : bf16
    %4 = vector.broadcast %cst_3 : bf16 to vector<16x640xbf16>
    %c0_4 = arith.constant 0 : index
    %c0_5 = arith.constant 0 : index
    %5 = vector.load %arg8[%c0_4, %c0_5] : memref<16x640xbf16, #tpu.memory_space<vmem>>, vector<16x640xbf16>
    tpu.vector_store %arg8[%c0_4, %c0_5], %4 {strides = array<i32>} : memref<16x640xbf16, #tpu.memory_space<vmem>>, vector<16x640xbf16>,
    %6 = tpu.iota {dimensions = array<i32: 1>} : vector<1x384xi32>
    %c384_i32 = arith.constant 384 : i32
    %c0_i32 = arith.constant 0 : i32
    %7 = arith.cmpi eq, %c384_i32, %c0_i32 : i32
    %c1_i32 = arith.constant 1 : i32
    %8 = arith.select %7, %c1_i32, %c384_i32 : i32
    %9 = vector.broadcast %8 : i32 to vector<1x384xi32>
    %10 = arith.remsi %6, %9 : vector<1x384xi32>
    %c0_i32_6 = arith.constant 0 : i32
    %11 = vector.broadcast %c0_i32_6 : i32 to vector<1x384xi32>
    %12 = arith.cmpi ne, %10, %11 : vector<1x384xi32>
    %c0_i32_7 = arith.constant 0 : i32
    %13 = vector.broadcast %c0_i32_7 : i32 to vector<1x384xi32>
    %14 = arith.cmpi slt, %10, %13 : vector<1x384xi32>
    %c0_i32_8 = arith.constant 0 : i32
    %15 = arith.cmpi slt, %8, %c0_i32_8 : i32
    %16 = vector.broadcast %15 : i1 to vector<1x384xi1>
    %17 = vector.broadcast %16 : vector<1x384xi1> to vector<1x384xi1>
    %18 = arith.xori %14, %17 : vector<1x384xi1>
    %19 = arith.andi %18, %12 : vector<1x384xi1>
    %20 = vector.broadcast %8 : i32 to vector<1x384xi32>
    %21 = arith.addi %10, %20 : vector<1x384xi32>
    %22 = arith.select %19, %21, %10 : vector<1x384xi1>, vector<1x384xi32>
    %c18_i32 = arith.constant 18 : i32
    %c0_i32_9 = arith.constant 0 : i32
    %23 = arith.cmpi eq, %c18_i32, %c0_i32_9 : i32
    %c1_i32_10 = arith.constant 1 : i32
    %24 = arith.select %23, %c1_i32_10, %c18_i32 : i32
    %25 = vector.broadcast %24 : i32 to vector<1x384xi32>
    %26 = arith.remsi %22, %25 : vector<1x384xi32>
    %c0_i32_11 = arith.constant 0 : i32
    %27 = vector.broadcast %c0_i32_11 : i32 to vector<1x384xi32>
    %28 = arith.cmpi ne, %26, %27 : vector<1x384xi32>
    %c0_i32_12 = arith.constant 0 : i32
    %29 = vector.broadcast %c0_i32_12 : i32 to vector<1x384xi32>
    %30 = arith.cmpi slt, %26, %29 : vector<1x384xi32>
    %c0_i32_13 = arith.constant 0 : i32
    %31 = arith.cmpi slt, %24, %c0_i32_13 : i32
    %32 = vector.broadcast %31 : i1 to vector<1x384xi1>
    %33 = vector.broadcast %32 : vector<1x384xi1> to vector<1x384xi1>
    %34 = arith.xori %30, %33 : vector<1x384xi1>
    %35 = arith.andi %34, %28 : vector<1x384xi1>
    %36 = vector.broadcast %24 : i32 to vector<1x384xi32>
    %37 = arith.addi %26, %36 : vector<1x384xi32>
    %38 = arith.select %35, %37, %26 : vector<1x384xi1>, vector<1x384xi32>
    %c288_i32 = arith.constant 288 : i32
    %39 = vector.broadcast %c288_i32 : i32 to vector<1x384xi32>
    %40 = arith.cmpi slt, %22, %39 : vector<1x384xi32>
    %c1_i32_14 = arith.constant 1 : i32
    %41 = vector.broadcast %c1_i32_14 : i32 to vector<1x384xi32>
    %42 = arith.cmpi sge, %38, %41 : vector<1x384xi32>
    %43 = arith.andi %40, %42 : vector<1x384xi1>
    %c16_i32 = arith.constant 16 : i32
    %44 = vector.broadcast %c16_i32 : i32 to vector<1x384xi32>
    %45 = arith.cmpi sle, %38, %44 : vector<1x384xi32>
    %46 = arith.andi %43, %45 : vector<1x384xi1>
    %c0_15 = arith.constant 0 : index
    %c0_16 = arith.constant 0 : index
    %c109 = arith.constant 109 : index
    %47 = vector.load %arg1[%c0_15, %c0_16, %c109] : memref<1x16x640xbf16, #tpu.memory_space<vmem>>, vector<1x16x384xbf16>
    %48 = vector.shape_cast %47 : vector<1x16x384xbf16> to vector<16x384xbf16>
    %c0_17 = arith.constant 0 : index
    %c0_18 = arith.constant 0 : index
    %49 = vector.load %arg9[%c0_17, %c0_18] : memref<288x384xbf16, #tpu.memory_space<vmem>>, vector<16x384xbf16>
    tpu.vector_store %arg9[%c0_17, %c0_18], %48 {strides = array<i32>} : memref<288x384xbf16, #tpu.memory_space<vmem>>, vector<16x384xbf16>,
    %c0_19 = arith.constant 0 : index
    %c0_20 = arith.constant 0 : index
    %c110 = arith.constant 110 : index
    %50 = vector.load %arg1[%c0_19, %c0_20, %c110] : memref<1x16x640xbf16, #tpu.memory_space<vmem>>, vector<1x16x384xbf16>
    %51 = vector.shape_cast %50 : vector<1x16x384xbf16> to vector<16x384xbf16>
    %c16 = arith.constant 16 : index
    %c0_21 = arith.constant 0 : index
    %52 = vector.load %arg9[%c16, %c0_21] : memref<288x384xbf16, #tpu.memory_space<vmem>>, vector<16x384xbf16>
    tpu.vector_store %arg9[%c16, %c0_21], %51 {strides = array<i32>} : memref<288x384xbf16, #tpu.memory_space<vmem>>, vector<16x384xbf16>,
    %c0_22 = arith.constant 0 : index
    %c0_23 = arith.constant 0 : index
    %c111 = arith.constant 111 : index
    %53 = vector.load %arg1[%c0_22, %c0_23, %c111] : memref<1x16x640xbf16, #tpu.memory_space<vmem>>, vector<1x16x384xbf16>
    %54 = vector.shape_cast %53 : vector<1x16x384xbf16> to vector<16x384xbf16>
    %c32 = arith.constant 32 : index
    %c0_24 = arith.constant 0 : index
    %55 = vector.load %arg9[%c32, %c0_24] : memref<288x384xbf16, #tpu.memory_space<vmem>>, vector<16x384xbf16>
    tpu.vector_store %arg9[%c32, %c0_24], %54 {strides = array<i32>} : memref<288x384xbf16, #tpu.memory_space<vmem>>, vector<16x384xbf16>,
    %c0_25 = arith.constant 0 : index
    %c0_26 = arith.constant 0 : index
    %c127 = arith.constant 127 : index
    %56 = vector.load %arg1[%c0_25, %c0_26, %c127] : memref<1x16x640xbf16, #tpu.memory_space<vmem>>, vector<1x16x384xbf16>
    %57 = vector.shape_cast %56 : vector<1x16x384xbf16> to vector<16x384xbf16>
    %c48 = arith.constant 48 : index
    %c0_27 = arith.constant 0 : index
    %58 = vector.load %arg9[%c48, %c0_27] : memref<288x384xbf16, #tpu.memory_space<vmem>>, vector<16x384xbf16>
    tpu.vector_store %arg9[%c48, %c0_27], %57 {strides = array<i32>} : memref<288x384xbf16, #tpu.memory_space<vmem>>, vector<16x384xbf16>,
    %c0_28 = arith.constant 0 : index
    %c0_29 = arith.constant 0 : index
    %c128 = arith.constant 128 : index
    %59 = vector.load %arg1[%c0_28, %c0_29, %c128] : memref<1x16x640xbf16, #tpu.memory_space<vmem>>, vector<1x16x384xbf16>
    %60 = vector.shape_cast %59 : vector<1x16x384xbf16> to vector<16x384xbf16>
    %c64 = arith.constant 64 : index
    %c0_30 = arith.constant 0 : index
    %61 = vector.load %arg9[%c64, %c0_30] : memref<288x384xbf16, #tpu.memory_space<vmem>>, vector<16x384xbf16>
    tpu.vector_store %arg9[%c64, %c0_30], %60 {strides = array<i32>} : memref<288x384xbf16, #tpu.memory_space<vmem>>, vector<16x384xbf16>,
    %c0_31 = arith.constant 0 : index
    %c0_32 = arith.constant 0 : index
    %c129 = arith.constant 129 : index
    %62 = vector.load %arg1[%c0_31, %c0_32, %c129] : memref<1x16x640xbf16, #tpu.memory_space<vmem>>, vector<1x16x384xbf16>
    %63 = vector.shape_cast %62 : vector<1x16x384xbf16> to vector<16x384xbf16>
    %c80 = arith.constant 80 : index
    %c0_33 = arith.constant 0 : index
    %64 = vector.load %arg9[%c80, %c0_33] : memref<288x384xbf16, #tpu.memory_space<vmem>>, vector<16x384xbf16>
    tpu.vector_store %arg9[%c80, %c0_33], %63 {strides = array<i32>} : memref<288x384xbf16, #tpu.memory_space<vmem>>, vector<16x384xbf16>,
    %c0_34 = arith.constant 0 : index
    %c0_35 = arith.constant 0 : index
    %c145 = arith.constant 145 : index
    %65 = vector.load %arg1[%c0_34, %c0_35, %c145] : memref<1x16x640xbf16, #tpu.memory_space<vmem>>, vector<1x16x384xbf16>
    %66 = vector.shape_cast %65 : vector<1x16x384xbf16> to vector<16x384xbf16>
    %c96 = arith.constant 96 : index
    %c0_36 = arith.constant 0 : index
    %67 = vector.load %arg9[%c96, %c0_36] : memref<288x384xbf16, #tpu.memory_space<vmem>>, vector<16x384xbf16>
    tpu.vector_store %arg9[%c96, %c0_36], %66 {strides = array<i32>} : memref<288x384xbf16, #tpu.memory_space<vmem>>, vector<16x384xbf16>,
    %c0_37 = arith.constant 0 : index
    %c0_38 = arith.constant 0 : index
    %c146 = arith.constant 146 : index
    %68 = vector.load %arg1[%c0_37, %c0_38, %c146] : memref<1x16x640xbf16, #tpu.memory_space<vmem>>, vector<1x16x384xbf16>
    %69 = vector.shape_cast %68 : vector<1x16x384xbf16> to vector<16x384xbf16>
    %c112 = arith.constant 112 : index
    %c0_39 = arith.constant 0 : index
    %70 = vector.load %arg9[%c112, %c0_39] : memref<288x384xbf16, #tpu.memory_space<vmem>>, vector<16x384xbf16>
    tpu.vector_store %arg9[%c112, %c0_39], %69 {strides = array<i32>} : memref<288x384xbf16, #tpu.memory_space<vmem>>, vector<16x384xbf16>,
    %c0_40 = arith.constant 0 : index
    %c0_41 = arith.constant 0 : index
    %c147 = arith.constant 147 : index
    %71 = vector.load %arg1[%c0_40, %c0_41, %c147] : memref<1x16x640xbf16, #tpu.memory_space<vmem>>, vector<1x16x384xbf16>
    %72 = vector.shape_cast %71 : vector<1x16x384xbf16> to vector<16x384xbf16>
    %c128_42 = arith.constant 128 : index
    %c0_43 = arith.constant 0 : index
    %73 = vector.load %arg9[%c128_42, %c0_43] : memref<288x384xbf16, #tpu.memory_space<vmem>>, vector<16x384xbf16>
    tpu.vector_store %arg9[%c128_42, %c0_43], %72 {strides = array<i32>} : memref<288x384xbf16, #tpu.memory_space<vmem>>, vector<16x384xbf16>,
    %c0_44 = arith.constant 0 : index
    %c0_45 = arith.constant 0 : index
    %74 = vector.load %arg3[%c0_44, %c0_45] : memref<96x288xbf16, #tpu.memory_space<vmem>>, vector<32x144xbf16>
    %c0_46 = arith.constant 0 : index
    %c0_47 = arith.constant 0 : index
    %75 = vector.load %arg9[%c0_46, %c0_47] : memref<288x384xbf16, #tpu.memory_space<vmem>>, vector<144x384xbf16>
    %cst_48 = arith.constant dense<0.000000e+00> : vector<32x384xf32>
    %76 = tpu.matmul %74, %75, %cst_48 {dimension_numbers = #tpu.dot_dimension_numbers<[1], [0], [0], [1], [0, 0, 1, 1], [], []>} : vector<32x144xbf16>, vector<144x384xbf16>, vector<32x384xf32> -> vector<32x384xf32>
    %c0_49 = arith.constant 0 : index
    %c0_50 = arith.constant 0 : index
    %77 = vector.load %arg4[%c0_49, %c0_50] : memref<96x1xf32, #tpu.memory_space<vmem>>, vector<32x1xf32>
    %78 = vector.broadcast %77 : vector<32x1xf32> to vector<32x384xf32>
    %79 = arith.addf %76, %78 : vector<32x384xf32>
    %cst_51 = arith.constant 0.000000e+00 : f32
    %80 = vector.broadcast %cst_51 : f32 to vector<32x384xf32>
    %81 = arith.maximumf %79, %80 : vector<32x384xf32>
    %cst_52 = arith.constant 0.000000e+00 : f32
    %82 = vector.shape_cast %46 : vector<1x384xi1> to vector<1x384xi1>
    %83 = vector.broadcast %82 : vector<1x384xi1> to vector<32x384xi1>
    %84 = vector.broadcast %cst_52 : f32 to vector<32x384xf32>
    %85 = arith.select %83, %81, %84 : vector<32x384xi1>, vector<32x384xf32>
    %86 = arith.truncf %85 : vector<32x384xf32> to vector<32x384xbf16>
    %c0_53 = arith.constant 0 : index
    %c128_54 = arith.constant 128 : index
    %87 = vector.load %arg7[%c0_53, %c128_54] : memref<32x640xbf16, #tpu.memory_space<vmem>>, vector<32x384xbf16>
    tpu.vector_store %arg7[%c0_53, %c128_54], %86 {strides = array<i32>} : memref<32x640xbf16, #tpu.memory_space<vmem>>, vector<32x384xbf16>,
    %c0_55 = arith.constant 0 : index
    %c109_56 = arith.constant 109 : index
    %88 = vector.load %arg7[%c0_55, %c109_56] : memref<32x640xbf16, #tpu.memory_space<vmem>>, vector<32x384xbf16>
    %c0_57 = arith.constant 0 : index
    %c0_58 = arith.constant 0 : index
    %89 = vector.load %arg9[%c0_57, %c0_58] : memref<288x384xbf16, #tpu.memory_space<vmem>>, vector<32x384xbf16>
    tpu.vector_store %arg9[%c0_57, %c0_58], %88 {strides = array<i32>} : memref<288x384xbf16, #tpu.memory_space<vmem>>, vector<32x384xbf16>,
    %c0_59 = arith.constant 0 : index
    %c110_60 = arith.constant 110 : index
    %90 = vector.load %arg7[%c0_59, %c110_60] : memref<32x640xbf16, #tpu.memory_space<vmem>>, vector<32x384xbf16>
    %c32_61 = arith.constant 32 : index
    %c0_62 = arith.constant 0 : index
    %91 = vector.load %arg9[%c32_61, %c0_62] : memref<288x384xbf16, #tpu.memory_space<vmem>>, vector<32x384xbf16>
    tpu.vector_store %arg9[%c32_61, %c0_62], %90 {strides = array<i32>} : memref<288x384xbf16, #tpu.memory_space<vmem>>, vector<32x384xbf16>,
    %c0_63 = arith.constant 0 : index
    %c111_64 = arith.constant 111 : index
    %92 = vector.load %arg7[%c0_63, %c111_64] : memref<32x640xbf16, #tpu.memory_space<vmem>>, vector<32x384xbf16>
    %c64_65 = arith.constant 64 : index
    %c0_66 = arith.constant 0 : index
    %93 = vector.load %arg9[%c64_65, %c0_66] : memref<288x384xbf16, #tpu.memory_space<vmem>>, vector<32x384xbf16>
    tpu.vector_store %arg9[%c64_65, %c0_66], %92 {strides = array<i32>} : memref<288x384xbf16, #tpu.memory_space<vmem>>, vector<32x384xbf16>,
    %c0_67 = arith.constant 0 : index
    %c127_68 = arith.constant 127 : index
    %94 = vector.load %arg7[%c0_67, %c127_68] : memref<32x640xbf16, #tpu.memory_space<vmem>>, vector<32x384xbf16>
    %c96_69 = arith.constant 96 : index
    %c0_70 = arith.constant 0 : index
    %95 = vector.load %arg9[%c96_69, %c0_70] : memref<288x384xbf16, #tpu.memory_space<vmem>>, vector<32x384xbf16>
    tpu.vector_store %arg9[%c96_69, %c0_70], %94 {strides = array<i32>} : memref<288x384xbf16, #tpu.memory_space<vmem>>, vector<32x384xbf16>,
    %c0_71 = arith.constant 0 : index
    %c128_72 = arith.constant 128 : index
    %96 = vector.load %arg7[%c0_71, %c128_72] : memref<32x640xbf16, #tpu.memory_space<vmem>>, vector<32x384xbf16>
    %c128_73 = arith.constant 128 : index
    %c0_74 = arith.constant 0 : index
    %97 = vector.load %arg9[%c128_73, %c0_74] : memref<288x384xbf16, #tpu.memory_space<vmem>>, vector<32x384xbf16>
    tpu.vector_store %arg9[%c128_73, %c0_74], %96 {strides = array<i32>} : memref<288x384xbf16, #tpu.memory_space<vmem>>, vector<32x384xbf16>,
    %c0_75 = arith.constant 0 : index
    %c129_76 = arith.constant 129 : index
    %98 = vector.load %arg7[%c0_75, %c129_76] : memref<32x640xbf16, #tpu.memory_space<vmem>>, vector<32x384xbf16>
    %c160 = arith.constant 160 : index
    %c0_77 = arith.constant 0 : index
    %99 = vector.load %arg9[%c160, %c0_77] : memref<288x384xbf16, #tpu.memory_space<vmem>>, vector<32x384xbf16>
    tpu.vector_store %arg9[%c160, %c0_77], %98 {strides = array<i32>} : memref<288x384xbf16, #tpu.memory_space<vmem>>, vector<32x384xbf16>,
    %c0_78 = arith.constant 0 : index
    %c145_79 = arith.constant 145 : index
    %100 = vector.load %arg7[%c0_78, %c145_79] : memref<32x640xbf16, #tpu.memory_space<vmem>>, vector<32x384xbf16>
    %c192 = arith.constant 192 : index
    %c0_80 = arith.constant 0 : index
    %101 = vector.load %arg9[%c192, %c0_80] : memref<288x384xbf16, #tpu.memory_space<vmem>>, vector<32x384xbf16>
    tpu.vector_store %arg9[%c192, %c0_80], %100 {strides = array<i32>} : memref<288x384xbf16, #tpu.memory_space<vmem>>, vector<32x384xbf16>,
    %c0_81 = arith.constant 0 : index
    %c146_82 = arith.constant 146 : index
    %102 = vector.load %arg7[%c0_81, %c146_82] : memref<32x640xbf16, #tpu.memory_space<vmem>>, vector<32x384xbf16>
    %c224 = arith.constant 224 : index
    %c0_83 = arith.constant 0 : index
    %103 = vector.load %arg9[%c224, %c0_83] : memref<288x384xbf16, #tpu.memory_space<vmem>>, vector<32x384xbf16>
    tpu.vector_store %arg9[%c224, %c0_83], %102 {strides = array<i32>} : memref<288x384xbf16, #tpu.memory_space<vmem>>, vector<32x384xbf16>,
    %c0_84 = arith.constant 0 : index
    %c147_85 = arith.constant 147 : index
    %104 = vector.load %arg7[%c0_84, %c147_85] : memref<32x640xbf16, #tpu.memory_space<vmem>>, vector<32x384xbf16>
    %c256 = arith.constant 256 : index
    %c0_86 = arith.constant 0 : index
    %105 = vector.load %arg9[%c256, %c0_86] : memref<288x384xbf16, #tpu.memory_space<vmem>>, vector<32x384xbf16>
    tpu.vector_store %arg9[%c256, %c0_86], %104 {strides = array<i32>} : memref<288x384xbf16, #tpu.memory_space<vmem>>, vector<32x384xbf16>,
    %c32_87 = arith.constant 32 : index
    %c0_88 = arith.constant 0 : index
    %106 = vector.load %arg3[%c32_87, %c0_88] : memref<96x288xbf16, #tpu.memory_space<vmem>>, vector<16x288xbf16>
    %c0_89 = arith.constant 0 : index
    %c0_90 = arith.constant 0 : index
    %107 = vector.load %arg9[%c0_89, %c0_90] : memref<288x384xbf16, #tpu.memory_space<vmem>>, vector<288x384xbf16>
    %cst_91 = arith.constant dense<0.000000e+00> : vector<16x384xf32>
    %108 = tpu.matmul %106, %107, %cst_91 {dimension_numbers = #tpu.dot_dimension_numbers<[1], [0], [0], [1], [0, 0, 1, 1], [], []>} : vector<16x288xbf16>, vector<288x384xbf16>, vector<16x384xf32> -> vector<16x384xf32>
    %109 = vector.extract_strided_slice %108 {offsets = [0, 0], sizes = [6, 384], strides = [1, 1]} : vector<16x384xf32> to vector<6x384xf32>
    %c32_92 = arith.constant 32 : index
    %c0_93 = arith.constant 0 : index
    %110 = vector.load %arg4[%c32_92, %c0_93] : memref<96x1xf32, #tpu.memory_space<vmem>>, vector<6x1xf32>
    %111 = vector.broadcast %110 : vector<6x1xf32> to vector<6x384xf32>
    %112 = arith.addf %109, %111 : vector<6x384xf32>
    %c0_94 = arith.constant 0 : index
    %c0_95 = arith.constant 0 : index
    %c0_96 = arith.constant 0 : index
    %113 = vector.load %arg5[%c0_94, %c0_95, %c0_96] : memref<1x6x384xf32, #tpu.memory_space<vmem>>, vector<1x6x384xf32>
    %114 = vector.shape_cast %113 : vector<1x6x384xf32> to vector<6x384xf32>
    %115 = vector.shape_cast %112 : vector<6x384xf32> to vector<1x6x384xf32>
    tpu.vector_store %arg5[%c0_94, %c0_95, %c0_96], %115 {strides = array<i32>} : memref<1x6x384xf32, #tpu.memory_space<vmem>>, vector<1x6x384xf32>,
    %116 = vector.extract_strided_slice %112 {offsets = [0, 0], sizes = [3, 384], strides = [1, 1]} : vector<6x384xf32> to vector<3x384xf32>
    %117 = vector.extract_strided_slice %112 {offsets = [3, 0], sizes = [3, 384], strides = [1, 1]} : vector<6x384xf32> to vector<3x384xf32>
    %cst_97 = arith.constant 5.000000e-01 : f32
    %118 = vector.broadcast %cst_97 : f32 to vector<3x384xf32>
    %119 = arith.mulf %118, %117 : vector<3x384xf32>
    %120 = math.exp %119 : vector<3x384xf32>
    %c0_98 = arith.constant 0 : index
    %c0_99 = arith.constant 0 : index
    %c0_100 = arith.constant 0 : index
    %121 = vector.load %arg2[%c0_98, %c0_99, %c0_100] : memref<1x3x384xf32, #tpu.memory_space<vmem>>, vector<1x3x384xf32>
    %122 = vector.shape_cast %121 : vector<1x3x384xf32> to vector<3x384xf32>
    %123 = arith.mulf %120, %122 : vector<3x384xf32>
    %124 = arith.addf %116, %123 : vector<3x384xf32>
    %cst_101 = arith.constant 0.000000e+00 : f32
    %125 = vector.shape_cast %46 : vector<1x384xi1> to vector<1x384xi1>
    %126 = vector.broadcast %125 : vector<1x384xi1> to vector<3x384xi1>
    %127 = vector.broadcast %cst_101 : f32 to vector<3x384xf32>
    %128 = arith.select %126, %124, %127 : vector<3x384xi1>, vector<3x384xf32>
    %129 = arith.truncf %128 : vector<3x384xf32> to vector<3x384xbf16>
    %c0_102 = arith.constant 0 : index
    %c128_103 = arith.constant 128 : index
    %130 = vector.load %arg8[%c0_102, %c128_103] : memref<16x640xbf16, #tpu.memory_space<vmem>>, vector<3x384xbf16>
    tpu.vector_store %arg8[%c0_102, %c128_103], %129 {strides = array<i32>} : memref<16x640xbf16, #tpu.memory_space<vmem>>, vector<3x384xbf16>,
    %c0_104 = arith.constant 0 : index
    %c109_105 = arith.constant 109 : index
    %131 = vector.load %arg8[%c0_104, %c109_105] : memref<16x640xbf16, #tpu.memory_space<vmem>>, vector<16x384xbf16>
    %c0_106 = arith.constant 0 : index
    %c0_107 = arith.constant 0 : index
    %132 = vector.load %arg9[%c0_106, %c0_107] : memref<288x384xbf16, #tpu.memory_space<vmem>>, vector<16x384xbf16>
    tpu.vector_store %arg9[%c0_106, %c0_107], %131 {strides = array<i32>} : memref<288x384xbf16, #tpu.memory_space<vmem>>, vector<16x384xbf16>,
    %c0_108 = arith.constant 0 : index
    %c110_109 = arith.constant 110 : index
    %133 = vector.load %arg8[%c0_108, %c110_109] : memref<16x640xbf16, #tpu.memory_space<vmem>>, vector<16x384xbf16>
    %c16_110 = arith.constant 16 : index
    %c0_111 = arith.constant 0 : index
    %134 = vector.load %arg9[%c16_110, %c0_111] : memref<288x384xbf16, #tpu.memory_space<vmem>>, vector<16x384xbf16>
    tpu.vector_store %arg9[%c16_110, %c0_111], %133 {strides = array<i32>} : memref<288x384xbf16, #tpu.memory_space<vmem>>, vector<16x384xbf16>,
    %c0_112 = arith.constant 0 : index
    %c111_113 = arith.constant 111 : index
    %135 = vector.load %arg8[%c0_112, %c111_113] : memref<16x640xbf16, #tpu.memory_space<vmem>>, vector<16x384xbf16>
    %c32_114 = arith.constant 32 : index
    %c0_115 = arith.constant 0 : index
    %136 = vector.load %arg9[%c32_114, %c0_115] : memref<288x384xbf16, #tpu.memory_space<vmem>>, vector<16x384xbf16>
    tpu.vector_store %arg9[%c32_114, %c0_115], %135 {strides = array<i32>} : memref<288x384xbf16, #tpu.memory_space<vmem>>, vector<16x384xbf16>,
    %c0_116 = arith.constant 0 : index
    %c127_117 = arith.constant 127 : index
    %137 = vector.load %arg8[%c0_116, %c127_117] : memref<16x640xbf16, #tpu.memory_space<vmem>>, vector<16x384xbf16>
    %c48_118 = arith.constant 48 : index
    %c0_119 = arith.constant 0 : index
    %138 = vector.load %arg9[%c48_118, %c0_119] : memref<288x384xbf16, #tpu.memory_space<vmem>>, vector<16x384xbf16>
    tpu.vector_store %arg9[%c48_118, %c0_119], %137 {strides = array<i32>} : memref<288x384xbf16, #tpu.memory_space<vmem>>, vector<16x384xbf16>,
    %c0_120 = arith.constant 0 : index
    %c128_121 = arith.constant 128 : index
    %139 = vector.load %arg8[%c0_120, %c128_121] : memref<16x640xbf16, #tpu.memory_space<vmem>>, vector<16x384xbf16>
    %c64_122 = arith.constant 64 : index
    %c0_123 = arith.constant 0 : index
    %140 = vector.load %arg9[%c64_122, %c0_123] : memref<288x384xbf16, #tpu.memory_space<vmem>>, vector<16x384xbf16>
    tpu.vector_store %arg9[%c64_122, %c0_123], %139 {strides = array<i32>} : memref<288x384xbf16, #tpu.memory_space<vmem>>, vector<16x384xbf16>,
    %c0_124 = arith.constant 0 : index
    %c129_125 = arith.constant 129 : index
    %141 = vector.load %arg8[%c0_124, %c129_125] : memref<16x640xbf16, #tpu.memory_space<vmem>>, vector<16x384xbf16>
    %c80_126 = arith.constant 80 : index
    %c0_127 = arith.constant 0 : index
    %142 = vector.load %arg9[%c80_126, %c0_127] : memref<288x384xbf16, #tpu.memory_space<vmem>>, vector<16x384xbf16>
    tpu.vector_store %arg9[%c80_126, %c0_127], %141 {strides = array<i32>} : memref<288x384xbf16, #tpu.memory_space<vmem>>, vector<16x384xbf16>,
    %c0_128 = arith.constant 0 : index
    %c145_129 = arith.constant 145 : index
    %143 = vector.load %arg8[%c0_128, %c145_129] : memref<16x640xbf16, #tpu.memory_space<vmem>>, vector<16x384xbf16>
    %c96_130 = arith.constant 96 : index
    %c0_131 = arith.constant 0 : index
    %144 = vector.load %arg9[%c96_130, %c0_131] : memref<288x384xbf16, #tpu.memory_space<vmem>>, vector<16x384xbf16>
    tpu.vector_store %arg9[%c96_130, %c0_131], %143 {strides = array<i32>} : memref<288x384xbf16, #tpu.memory_space<vmem>>, vector<16x384xbf16>,
    %c0_132 = arith.constant 0 : index
    %c146_133 = arith.constant 146 : index
    %145 = vector.load %arg8[%c0_132, %c146_133] : memref<16x640xbf16, #tpu.memory_space<vmem>>, vector<16x384xbf16>
    %c112_134 = arith.constant 112 : index
    %c0_135 = arith.constant 0 : index
    %146 = vector.load %arg9[%c112_134, %c0_135] : memref<288x384xbf16, #tpu.memory_space<vmem>>, vector<16x384xbf16>
    tpu.vector_store %arg9[%c112_134, %c0_135], %145 {strides = array<i32>} : memref<288x384xbf16, #tpu.memory_space<vmem>>, vector<16x384xbf16>,
    %c0_136 = arith.constant 0 : index
    %c147_137 = arith.constant 147 : index
    %147 = vector.load %arg8[%c0_136, %c147_137] : memref<16x640xbf16, #tpu.memory_space<vmem>>, vector<16x384xbf16>
    %c128_138 = arith.constant 128 : index
    %c0_139 = arith.constant 0 : index
    %148 = vector.load %arg9[%c128_138, %c0_139] : memref<288x384xbf16, #tpu.memory_space<vmem>>, vector<16x384xbf16>
    tpu.vector_store %arg9[%c128_138, %c0_139], %147 {strides = array<i32>} : memref<288x384xbf16, #tpu.memory_space<vmem>>, vector<16x384xbf16>,
    %c48_140 = arith.constant 48 : index
    %c0_141 = arith.constant 0 : index
    %149 = vector.load %arg3[%c48_140, %c0_141] : memref<96x288xbf16, #tpu.memory_space<vmem>>, vector<32x144xbf16>
    %c0_142 = arith.constant 0 : index
    %c0_143 = arith.constant 0 : index
    %150 = vector.load %arg9[%c0_142, %c0_143] : memref<288x384xbf16, #tpu.memory_space<vmem>>, vector<144x384xbf16>
    %cst_144 = arith.constant dense<0.000000e+00> : vector<32x384xf32>
    %151 = tpu.matmul %149, %150, %cst_144 {dimension_numbers = #tpu.dot_dimension_numbers<[1], [0], [0], [1], [0, 0, 1, 1], [], []>} : vector<32x144xbf16>, vector<144x384xbf16>, vector<32x384xf32> -> vector<32x384xf32>
    %c48_145 = arith.constant 48 : index
    %c0_146 = arith.constant 0 : index
    %152 = vector.load %arg4[%c48_145, %c0_146] : memref<96x1xf32, #tpu.memory_space<vmem>>, vector<32x1xf32>
    %153 = vector.broadcast %152 : vector<32x1xf32> to vector<32x384xf32>
    %154 = arith.addf %151, %153 : vector<32x384xf32>
    %cst_147 = arith.constant 0.000000e+00 : f32
    %155 = vector.broadcast %cst_147 : f32 to vector<32x384xf32>
    %156 = arith.maximumf %154, %155 : vector<32x384xf32>
    %cst_148 = arith.constant 0.000000e+00 : f32
    %157 = vector.shape_cast %46 : vector<1x384xi1> to vector<1x384xi1>
    %158 = vector.broadcast %157 : vector<1x384xi1> to vector<32x384xi1>
    %159 = vector.broadcast %cst_148 : f32 to vector<32x384xf32>
    %160 = arith.select %158, %156, %159 : vector<32x384xi1>, vector<32x384xf32>
    %161 = arith.truncf %160 : vector<32x384xf32> to vector<32x384xbf16>
    %c0_149 = arith.constant 0 : index
    %c128_150 = arith.constant 128 : index
    %162 = vector.load %arg7[%c0_149, %c128_150] : memref<32x640xbf16, #tpu.memory_space<vmem>>, vector<32x384xbf16>
    tpu.vector_store %arg7[%c0_149, %c128_150], %161 {strides = array<i32>} : memref<32x640xbf16, #tpu.memory_space<vmem>>, vector<32x384xbf16>,
    %c0_151 = arith.constant 0 : index
    %c109_152 = arith.constant 109 : index
    %163 = vector.load %arg7[%c0_151, %c109_152] : memref<32x640xbf16, #tpu.memory_space<vmem>>, vector<32x384xbf16>
    %c0_153 = arith.constant 0 : index
    %c0_154 = arith.constant 0 : index
    %164 = vector.load %arg9[%c0_153, %c0_154] : memref<288x384xbf16, #tpu.memory_space<vmem>>, vector<32x384xbf16>
    tpu.vector_store %arg9[%c0_153, %c0_154], %163 {strides = array<i32>} : memref<288x384xbf16, #tpu.memory_space<vmem>>, vector<32x384xbf16>,
    %c0_155 = arith.constant 0 : index
    %c110_156 = arith.constant 110 : index
    %165 = vector.load %arg7[%c0_155, %c110_156] : memref<32x640xbf16, #tpu.memory_space<vmem>>, vector<32x384xbf16>
    %c32_157 = arith.constant 32 : index
    %c0_158 = arith.constant 0 : index
    %166 = vector.load %arg9[%c32_157, %c0_158] : memref<288x384xbf16, #tpu.memory_space<vmem>>, vector<32x384xbf16>
    tpu.vector_store %arg9[%c32_157, %c0_158], %165 {strides = array<i32>} : memref<288x384xbf16, #tpu.memory_space<vmem>>, vector<32x384xbf16>,
    %c0_159 = arith.constant 0 : index
    %c111_160 = arith.constant 111 : index
    %167 = vector.load %arg7[%c0_159, %c111_160] : memref<32x640xbf16, #tpu.memory_space<vmem>>, vector<32x384xbf16>
    %c64_161 = arith.constant 64 : index
    %c0_162 = arith.constant 0 : index
    %168 = vector.load %arg9[%c64_161, %c0_162] : memref<288x384xbf16, #tpu.memory_space<vmem>>, vector<32x384xbf16>
    tpu.vector_store %arg9[%c64_161, %c0_162], %167 {strides = array<i32>} : memref<288x384xbf16, #tpu.memory_space<vmem>>, vector<32x384xbf16>,
    %c0_163 = arith.constant 0 : index
    %c127_164 = arith.constant 127 : index
    %169 = vector.load %arg7[%c0_163, %c127_164] : memref<32x640xbf16, #tpu.memory_space<vmem>>, vector<32x384xbf16>
    %c96_165 = arith.constant 96 : index
    %c0_166 = arith.constant 0 : index
    %170 = vector.load %arg9[%c96_165, %c0_166] : memref<288x384xbf16, #tpu.memory_space<vmem>>, vector<32x384xbf16>
    tpu.vector_store %arg9[%c96_165, %c0_166], %169 {strides = array<i32>} : memref<288x384xbf16, #tpu.memory_space<vmem>>, vector<32x384xbf16>,
    %c0_167 = arith.constant 0 : index
    %c128_168 = arith.constant 128 : index
    %171 = vector.load %arg7[%c0_167, %c128_168] : memref<32x640xbf16, #tpu.memory_space<vmem>>, vector<32x384xbf16>
    %c128_169 = arith.constant 128 : index
    %c0_170 = arith.constant 0 : index
    %172 = vector.load %arg9[%c128_169, %c0_170] : memref<288x384xbf16, #tpu.memory_space<vmem>>, vector<32x384xbf16>
    tpu.vector_store %arg9[%c128_169, %c0_170], %171 {strides = array<i32>} : memref<288x384xbf16, #tpu.memory_space<vmem>>, vector<32x384xbf16>,
    %c0_171 = arith.constant 0 : index
    %c129_172 = arith.constant 129 : index
    %173 = vector.load %arg7[%c0_171, %c129_172] : memref<32x640xbf16, #tpu.memory_space<vmem>>, vector<32x384xbf16>
    %c160_173 = arith.constant 160 : index
    %c0_174 = arith.constant 0 : index
    %174 = vector.load %arg9[%c160_173, %c0_174] : memref<288x384xbf16, #tpu.memory_space<vmem>>, vector<32x384xbf16>
    tpu.vector_store %arg9[%c160_173, %c0_174], %173 {strides = array<i32>} : memref<288x384xbf16, #tpu.memory_space<vmem>>, vector<32x384xbf16>,
    %c0_175 = arith.constant 0 : index
    %c145_176 = arith.constant 145 : index
    %175 = vector.load %arg7[%c0_175, %c145_176] : memref<32x640xbf16, #tpu.memory_space<vmem>>, vector<32x384xbf16>
    %c192_177 = arith.constant 192 : index
    %c0_178 = arith.constant 0 : index
    %176 = vector.load %arg9[%c192_177, %c0_178] : memref<288x384xbf16, #tpu.memory_space<vmem>>, vector<32x384xbf16>
    tpu.vector_store %arg9[%c192_177, %c0_178], %175 {strides = array<i32>} : memref<288x384xbf16, #tpu.memory_space<vmem>>, vector<32x384xbf16>,
    %c0_179 = arith.constant 0 : index
    %c146_180 = arith.constant 146 : index
    %177 = vector.load %arg7[%c0_179, %c146_180] : memref<32x640xbf16, #tpu.memory_space<vmem>>, vector<32x384xbf16>
    %c224_181 = arith.constant 224 : index
    %c0_182 = arith.constant 0 : index
    %178 = vector.load %arg9[%c224_181, %c0_182] : memref<288x384xbf16, #tpu.memory_space<vmem>>, vector<32x384xbf16>
    tpu.vector_store %arg9[%c224_181, %c0_182], %177 {strides = array<i32>} : memref<288x384xbf16, #tpu.memory_space<vmem>>, vector<32x384xbf16>,
    %c0_183 = arith.constant 0 : index
    %c147_184 = arith.constant 147 : index
    %179 = vector.load %arg7[%c0_183, %c147_184] : memref<32x640xbf16, #tpu.memory_space<vmem>>, vector<32x384xbf16>
    %c256_185 = arith.constant 256 : index
    %c0_186 = arith.constant 0 : index
    %180 = vector.load %arg9[%c256_185, %c0_186] : memref<288x384xbf16, #tpu.memory_space<vmem>>, vector<32x384xbf16>
    tpu.vector_store %arg9[%c256_185, %c0_186], %179 {strides = array<i32>} : memref<288x384xbf16, #tpu.memory_space<vmem>>, vector<32x384xbf16>,
    %c80_187 = arith.constant 80 : index
    %c0_188 = arith.constant 0 : index
    %181 = vector.load %arg3[%c80_187, %c0_188] : memref<96x288xbf16, #tpu.memory_space<vmem>>, vector<16x288xbf16>
    %c0_189 = arith.constant 0 : index
    %c0_190 = arith.constant 0 : index
    %182 = vector.load %arg9[%c0_189, %c0_190] : memref<288x384xbf16, #tpu.memory_space<vmem>>, vector<288x384xbf16>
    %cst_191 = arith.constant dense<0.000000e+00> : vector<16x384xf32>
    %183 = tpu.matmul %181, %182, %cst_191 {dimension_numbers = #tpu.dot_dimension_numbers<[1], [0], [0], [1], [0, 0, 1, 1], [], []>} : vector<16x288xbf16>, vector<288x384xbf16>, vector<16x384xf32> -> vector<16x384xf32>
    %184 = vector.extract_strided_slice %183 {offsets = [0, 0], sizes = [3, 384], strides = [1, 1]} : vector<16x384xf32> to vector<3x384xf32>
    %c80_192 = arith.constant 80 : index
    %c0_193 = arith.constant 0 : index
    %185 = vector.load %arg4[%c80_192, %c0_193] : memref<96x1xf32, #tpu.memory_space<vmem>>, vector<3x1xf32>
    %186 = vector.broadcast %185 : vector<3x1xf32> to vector<3x384xf32>
    %187 = arith.addf %184, %186 : vector<3x384xf32>
    %c0_194 = arith.constant 0 : index
    %c0_195 = arith.constant 0 : index
    %c0_196 = arith.constant 0 : index
    %188 = vector.load %arg6[%c0_194, %c0_195, %c0_196] : memref<1x3x384xf32, #tpu.memory_space<vmem>>, vector<1x3x384xf32>
    %189 = vector.shape_cast %188 : vector<1x3x384xf32> to vector<3x384xf32>
    %190 = vector.shape_cast %187 : vector<3x384xf32> to vector<1x3x384xf32>
    tpu.vector_store %arg6[%c0_194, %c0_195, %c0_196], %190 {strides = array<i32>} : memref<1x3x384xf32, #tpu.memory_space<vmem>>, vector<1x3x384xf32>,
    return
  }
  func.func @transform_0(%arg0: i32) -> (i32, i32, i32) {
    %c0_i32 = arith.constant 0 : i32
    %c0_i32_0 = arith.constant 0 : i32
    %c0_i32_1 = arith.constant 0 : i32
    return %arg0, %c0_i32, %c0_i32_0 : i32, i32, i32
  }
  func.func @transform_1(%arg0: i32) -> (i32, i32, i32) {
    %c0_i32 = arith.constant 0 : i32
    %c0_i32_0 = arith.constant 0 : i32
    %c0_i32_1 = arith.constant 0 : i32
    return %arg0, %c0_i32, %c0_i32_0 : i32, i32, i32
  }
  func.func @transform_2(%arg0: i32) -> (i32, i32) {
    %c0_i32 = arith.constant 0 : i32
    %c0_i32_0 = arith.constant 0 : i32
    %c0_i32_1 = arith.constant 0 : i32
    return %c0_i32, %c0_i32_0 : i32, i32
  }
  func.func @transform_3(%arg0: i32) -> (i32, i32) {
    %c0_i32 = arith.constant 0 : i32
    %c0_i32_0 = arith.constant 0 : i32
    %c0_i32_1 = arith.constant 0 : i32
    return %c0_i32, %c0_i32_0 : i32, i32
  }
  func.func @transform_4(%arg0: i32) -> (i32, i32, i32) {
    %c0_i32 = arith.constant 0 : i32
    %c0_i32_0 = arith.constant 0 : i32
    %c0_i32_1 = arith.constant 0 : i32
    return %arg0, %c0_i32, %c0_i32_0 : i32, i32, i32
  }
  func.func @transform_5(%arg0: i32) -> (i32, i32, i32) {
    %c0_i32 = arith.constant 0 : i32
    %c0_i32_0 = arith.constant 0 : i32
    %c0_i32_1 = arith.constant 0 : i32
    return %arg0, %c0_i32, %c0_i32_0 : i32, i32, i32
  }
}

</mosaic_0001>

<bundles_post_ra>
// kernel: vae_forward.1
= control target key start
LH: loop header
LB: loop body
LE: loop exit
PB: predicated region body
PF: predicated region fallthrough
CT: control target
= control target key end

     0   :  { %s3201_s18 = smov 0   ;;  %s4281_s0 = inlined_call_operand.vmem [shape: bf16[2,16,640], index: 0, kind: input, shape index: {}]   ;;  %s4282_s1 = inlined_call_operand.vmem [shape: f32[2,3,384], index: 1, kind: input, shape index: {}]   ;;  %s4283_s2 = inlined_call_operand.vmem [shape: bf16[96,288], index: 2, kind: input, shape index: {}]   ;;  %s4284_s3 = inlined_call_operand.vmem [shape: f32[96,1], index: 3, kind: input, shape index: {}]   ;;  %s4285_s4 = inlined_call_operand.vmem [shape: f32[2,6,384], index: 4, kind: output, shape index: {0}]   ;;  %s4286_s5 = inlined_call_operand.vmem [shape: f32[2,3,384], index: 5, kind: output, shape index: {1}]  }
   0x1 LB: > { %s2838_s19 = sadd.s32 4294967295, %s3158_s18   ;;  %p2842_p0 = scmp.ge.s32.totalorder %s3158_s18, 1  ;;  %s3158_s18 = sphi %s3201_s18, %s16_s18  }
   0x2   : > { %p200_p1 = scmp.lt.s32.totalorder %s3158_s18, 3 }
   0x4   : > { %p201_p2 = pnand %p2842_p0, %p200_p1 }
   0x5   : > { %p238_p3 = scmp.lt.s32.totalorder (!%p201_p2), %s2838_s19, 1  ;;  %s3160_s24 = smov (!%p201_p2), 19   ;;  %v3125_v6 = vld [vmem:[%s4283_s2 + $0x4] ss:$12 sps:$4 sm:$0xff] (!%p201_p2)   ;;  %vm4287_vm0 = vcmask (!%p201_p2), 130048   ;;  %v3167_v7 = vmov (!%p201_p2), 0  }
   0x6   : > { %204 = sbr.rel (%p201_p2) target bundleno = 1751 (0x6d7), region = 36  ;;  %s3161_s25 = smov (!%p201_p2), 18   ;;  %2889 = vmatprep.mubr.msk.bf16.mxu0 (!%p201_p2), %vm4287_vm0, %v3125_v6  ;;  %263 = vst [vmem:[#allocation3] sm:$0xff] (!%p201_p2), %v3167_v7  ;;  %264 = vst [vmem:[#allocation3 + $0x8] sm:$0xff] (!%p201_p2), %v3167_v7  ;;  %843 = vmatprep.subr.bf16.mxu1 (!%p201_p2), %v3167_v7  ;;  %v741_v10 = vld [vmem:[%s4284_s3] sm:$0xff] (!%p201_p2)  ;;  %v742_v11 = vld [vmem:[%s4284_s3 + $0x8] sm:$0xff] (!%p201_p2) }
   0x7   : > { %s3162_s26 = smov (!%p201_p2), 17   ;;  %s3163_s27 = smov (!%p201_p2), 1   ;;  %265 = vst [vmem:[#allocation3 + $0x10] sm:$0xff] (!%p201_p2), %v3167_v7  ;;  %266 = vst [vmem:[#allocation3 + $0x18] sm:$0xff] (!%p201_p2), %v3167_v7  ;;  %2891 = vmatprep.mubr.msk.bf16.mxu1 (!%p201_p2), %vm4287_vm0, %v3125_v6  ;;  %3050 = vset.pattern.permute.xlu1 (!%p201_p2), %v3167_v7  ;;  %v744_v12 = vld [vmem:[%s4284_s3 + $0x18] sm:$0xff] (!%p201_p2)  ;;  %v743_v13 = vld [vmem:[%s4284_s3 + $0x10] sm:$0xff] (!%p201_p2) }
   0x8   : > { %s3164_s28 = smov (!%p201_p2), 127   ;;  %s3165_s29 = smov (!%p201_p2), 111   ;;  %3049 = vset.pattern.permute.xlu0 (!%p201_p2), %v3167_v7  ;;  %vm4292_vm1 = vcmask (!%p201_p2), 154624   ;;  %vm449_vm2 = vcmask (!%p201_p2), 146432   ;;  %vm487_vm3 = vcmask (!%p201_p2), 138240   ;;  %vm4291_vm4 = vcmask (!%p201_p2), 7168  }
   0x9   : > { %s3166_s7 = smov (!%p201_p2), 110   ;;  %s3168_s8 = smov (!%p201_p2), 109   ;;  %vm4290_vm5 = vcmask (!%p201_p2), 1039360   ;;  %vm4289_vm6 = vcmask (!%p201_p2), 908288   ;;  %vm4288_vm7 = vcmask (!%p201_p2), 900096   ;;  %vm700_vm8 = vcmask (!%p201_p2), 891904  }
   0xa   : > { %v3123_v54 = vld [vmem:[%s4283_s2] ss:$12 sps:$4 sm:$0xff] (!%p201_p2)   ;;  %v3127_v55 = vld [vmem:[%s4283_s2 + $0x1c] ss:$12 sps:$4 sm:$0xff] (!%p201_p2)   ;;  %v3129_v61 = vld [vmem:[%s4283_s2 + $0x18] ss:$12 sps:$4 sm:$0xff] (!%p201_p2)  }
   0xd   : > { %s4381_s19 = smov (!%p238_p3, %s2838_s19), 1 }
   0xe   : > { %s3015_s20 = smul.u32 40, %s4381_s19 }
   0xf   : > { %s3017_s16 = smul.u32 24, %s4381_s19 }
  0x10   : > { %s3215_s23 = scalar_lea.vmem %s4281_s0, %s3015_s20  ;;  %s3016_s22 = smul.u32 12, %s4381_s19 }
  0x11   : > { %v3111_v0 = vld [vmem:[%s3215_s23 + $0x4] ss:$20 sps:$4 sm:$0xff]   ;;  %v3113_v1 = vld [vmem:[%s3215_s23] ss:$20 sps:$4 sm:$0xff]   ;;  %v3114_v2 = vld [vmem:[%s3215_s23 + $0x8] ss:$20 sps:$4 sm:$0xff]   ;;  %s3767_s21 = scalar_lea.vmem %s4285_s4, %s3017_s16 }
  0x12   : > { %405 = vrot.lane.b32.xlu0 %v3111_v0, %s3160_s24  ;;  %403 = vrot.lane.b32.xlu1 %v3113_v1, %s3160_s24  ;;  %v3232_v3 = vld [vmem:[%s3215_s23 + $0x8] ss:$20 sps:$4 sm:$0xff]   ;;  %v3118_v4 = vld [vmem:[%s3215_s23 + $0xc] ss:$20 sps:$4 sm:$0xff]   ;;  %s257_s13 = scalar_lea.vmem %s4286_s5, %s3016_s22 }
  0x13   : > { %v3239_v5 = vld [vmem:[%s3215_s23 + $0x4] ss:$20 sps:$4 sm:$0xff]   ;;  %v3121_v8 = vld [vmem:[%s3215_s23 + $0xc] ss:$20 sps:$4 sm:$0xff]  }
  0x14   : > { %v3122_v9 = vld [vmem:[%s3215_s23 + $0x10] ss:$20 sps:$4 sm:$0xff]  }
  0x16   : > { %407 = vrot.lane.b32.xlu0 %v3114_v2, %s3160_s24  ;;  %443 = vrot.lane.b32.xlu1 %v3111_v0, %s3161_s25 }
  0x1a   : > { %445 = vrot.lane.b32.xlu0 %v3114_v2, %s3161_s25  ;;  %441 = vrot.lane.b32.xlu1 %v3113_v1, %s3161_s25 }
  0x1e   : > { %481 = vrot.lane.b32.xlu0 %v3111_v0, %s3162_s26  ;;  %483 = vrot.lane.b32.xlu1 %v3114_v2, %s3162_s26 }
  0x22   : > { %479 = vrot.lane.b32.xlu0 %v3113_v1, %s3162_s26  ;;  %519 = vrot.lane.b32.xlu1 %v3111_v0, %s3163_s27 }
  0x26   : > { %521 = vrot.lane.b32.xlu0 %v3114_v2, %s3163_s27  ;;  %517 = vrot.lane.b32.xlu1 %v3113_v1, %s3163_s27  ;;  %v3126_v1 = vld [vmem:[%s3215_s23 + $0xc] ss:$20 sps:$4 sm:$0xff]   ;;  %s3777_s23 = scalar_lea.vmem %s4282_s1, %s3016_s22 }
  0x2a   : > { %580 = vrot.lane.b32.xlu0 %v3232_v3, %s3164_s28  ;;  %582 = vrot.lane.b32.xlu1 %v3118_v4, %s3164_s28 }
  0x2e   : > { %578 = vrot.lane.b32.xlu0 %v3239_v5, %s3164_s28  ;;  %618 = vrot.lane.b32.xlu1 %v3232_v3, %s3165_s29 }
  0x32   : > { %620 = vrot.lane.b32.xlu0 %v3118_v4, %s3165_s29  ;;  %616 = vrot.lane.b32.xlu1 %v3239_v5, %s3165_s29 }
  0x36   : > { %656 = vrot.lane.b32.xlu0 %v3232_v3, %s3166_s7  ;;  %658 = vrot.lane.b32.xlu1 %v3118_v4, %s3166_s7 }
  0x3a   : > { %654 = vrot.lane.b32.xlu0 %v3239_v5, %s3166_s7  ;;  %694 = vrot.lane.b32.xlu1 %v3232_v3, %s3168_s8 }
  0x3e   : > { %696 = vrot.lane.b32.xlu0 %v3118_v4, %s3168_s8  ;;  %692 = vrot.lane.b32.xlu1 %v3239_v5, %s3168_s8 }
  0x42   : > { %409 = vrot.lane.b32.xlu0 %v3121_v8, %s3160_s24  ;;  %447 = vrot.lane.b32.xlu1 %v3121_v8, %s3161_s25 }
  0x46   : > { %485 = vrot.lane.b32.xlu0 %v3121_v8, %s3162_s26  ;;  %523 = vrot.lane.b32.xlu1 %v3121_v8, %s3163_s27 }
  0x4a   : > { %584 = vrot.lane.b32.xlu0 %v3122_v9, %s3164_s28  ;;  %622 = vrot.lane.b32.xlu1 %v3122_v9, %s3165_s29 }
  0x4e   : > { %660 = vrot.lane.b32.xlu0 %v3122_v9, %s3166_s7  ;;  %698 = vrot.lane.b32.xlu1 %v3122_v9, %s3168_s8 }
  0x52   : > { %747 = vperm.xlu0 %3049, %v741_v10   ;;  %752 = vperm.xlu1 %3050, %v742_v11   ;;  %v268_v11 = vlaneseq }
  0x56   : > { %762 = vperm.xlu0 %3049, %v744_v12   ;;  %757 = vperm.xlu1 %3050, %v743_v13   ;;  %v269_v12 = vand.u32 127, %v268_v11 }
  0x58   : > { %v270_v13 = vadd.s32 128, %v269_v12 }
  0x5a   : > { %3052 = vrot.lane.b32.xlu1 %v3167_v7, %s3160_s24  ;;  %3057 = vrot.lane.b32.xlu0 %v3167_v7, %s3161_s25 }
  0x5e   : > { %3062 = vrot.lane.b32.xlu1 %v3167_v7, %s3162_s26  ;;  %3067 = vrot.lane.b32.xlu0 %v3167_v7, %s3163_s27 }
  0x84   : > { %v406_v14 = vpop.permute.xlu0 %405  ;;  %v404_v15 = vpop.permute.xlu1 %403 }
  0x85   : > { %v412_v19 = vsel %vm4292_vm1, %v404_v15, %v406_v14 }
  0x88   : > { %v3293_v16 = vpop.permute.xlu0 %407  ;;  %v444_v17 = vpop.permute.xlu1 %443 }
  0x89   : > { %v413_v18 = vsel %vm4292_vm1, %v406_v14, %v3293_v16  ;;  %v3360_v14 = vmul.u32.u64.low 2863311531, %v269_v12  ;;  %v3361_v15 = vmul.u32.u64.high 2863311531, %v269_v12, %v3360_v14 }
  0x8a   : > { %790 = vmatprep.subr.bf16.mxu0 %v413_v18 }
  0x8b   : > { %791 = vmatpush1.bf16.msra.mxu0 %v412_v19  ;;  %v278_v18 = vshrl.u32 %v3361_v15, 8 }
  0x8c   : > { %v3298_v20 = vpop.permute.xlu0 %445  ;;  %v442_v21 = vpop.permute.xlu1 %441 }
  0x8d   : > { %v451_v22 = vsel %vm449_vm2, %v444_v17, %v3298_v20  ;;  %v450_v23 = vsel %vm449_vm2, %v442_v21, %v444_v17 }
  0x8e   : > { %792 = vmatprep.subr.bf16.mxu0 %v451_v22 }
  0x8f   : > { %793 = vmatpush1.bf16.msra.mxu0 %v450_v23 }
  0x90   : > { %v482_v24 = vpop.permute.xlu0 %481  ;;  %v3303_v25 = vpop.permute.xlu1 %483 }
  0x91   : > { %v489_v26 = vsel %vm487_vm3, %v482_v24, %v3303_v25 }
  0x92   : > { %794 = vmatprep.subr.bf16.mxu0 %v489_v26 }
  0x94   : > { %v480_v27 = vpop.permute.xlu0 %479  ;;  %v520_v28 = vpop.permute.xlu1 %519 }
  0x95   : > { %v488_v29 = vsel %vm487_vm3, %v480_v27, %v482_v24 }
  0x96   : > { %795 = vmatpush1.bf16.msra.mxu0 %v488_v29 }
  0x98   : > { %v522_v30 = vpop.permute.xlu0 %521  ;;  %v518_v31 = vpop.permute.xlu1 %517 }
  0x99   : > { %v527_v32 = vsel %vm4291_vm4, %v520_v28, %v522_v30  ;;  %v526_v33 = vsel %vm4291_vm4, %v518_v31, %v520_v28  ;;  %v271_v31 = vadd.s32 256, %v269_v12 }
  0x9a   : > { %796 = vmatprep.subr.bf16.mxu0 %v527_v32 }
  0x9b   : > { %797 = vmatpush1.bf16.msra.mxu0 %v526_v33 }
  0x9c   : > { %v581_v34 = vpop.permute.xlu0 %580  ;;  %798 = vmatprep.subr.bf16.mxu0 %v3232_v3  ;;  %v583_v35 = vpop.permute.xlu1 %582 }
  0x9d   : > { %v588_v36 = vsel %vm4290_vm5, %v581_v34, %v583_v35 }
  0x9f   : > { %799 = vmatpush1.bf16.msra.mxu0 %v3239_v5 }
  0xa0   : > { %v579_v37 = vpop.permute.xlu0 %578  ;;  %800 = vmatprep.subr.bf16.mxu0 %v588_v36  ;;  %v619_v38 = vpop.permute.xlu1 %618 }
  0xa1   : > { %v587_v39 = vsel %vm4290_vm5, %v579_v37, %v581_v34 }
  0xa3   : > { %801 = vmatpush1.bf16.msra.mxu0 %v587_v39 }
  0xa4   : > { %v621_v40 = vpop.permute.xlu0 %620  ;;  %v617_v41 = vpop.permute.xlu1 %616 }
  0xa5   : > { %v626_v42 = vsel %vm4289_vm6, %v619_v38, %v621_v40  ;;  %v625_v43 = vsel %vm4289_vm6, %v617_v41, %v619_v38 }
  0xa6   : > { %802 = vmatprep.subr.bf16.mxu0 %v626_v42 }
  0xa7   : > { %803 = vmatpush1.bf16.msra.mxu0 %v625_v43 }
  0xa8   : > { %v657_v44 = vpop.permute.xlu0 %656  ;;  %v659_v45 = vpop.permute.xlu1 %658 }
  0xa9   : > { %v664_v46 = vsel %vm4288_vm7, %v657_v44, %v659_v45 }
  0xaa   : > { %804 = vmatprep.subr.bf16.mxu0 %v664_v46 }
  0xac   : > { %v655_v47 = vpop.permute.xlu0 %654  ;;  %v695_v48 = vpop.permute.xlu1 %694 }
  0xad   : > { %v663_v49 = vsel %vm4288_vm7, %v655_v47, %v657_v44 }
  0xae   : > { %805 = vmatpush1.bf16.msra.mxu0 %v663_v49 }
  0xb0   : > { %v697_v50 = vpop.permute.xlu0 %696  ;;  %v693_v51 = vpop.permute.xlu1 %692 }
  0xb1   : > { %v702_v52 = vsel %vm700_vm8, %v695_v48, %v697_v50  ;;  %v701_v53 = vsel %vm700_vm8, %v693_v51, %v695_v48 }
  0xb2   : > { %806 = vmatprep.subr.bf16.mxu0 %v702_v52 }
  0xb3   : > { %807 = vmatpush1.bf16.msra.mxu0 %v701_v53 }
  0xb4   : > { %v410_v56 = vpop.permute.xlu0 %409  ;;  %v448_v58 = vpop.permute.xlu1 %447 }
  0xb5   : > { %v414_v57 = vsel %vm4292_vm1, %v3293_v16, %v410_v56  ;;  %v452_v59 = vsel %vm449_vm2, %v3298_v20, %v448_v58  ;;  %v3363_v16 = vmul.u32.u64.low 2863311531, %v270_v13  ;;  %v3364_v17 = vmul.u32.u64.high 2863311531, %v270_v13, %v3363_v16 }
  0xb6   : > { %823 = vmatmul.mubr.bf16.vlgmr.msra.gmra.mrb[0].mxu0 %v3123_v54  ;;  %844 = vmatpush1.bf16.msra.mxu1 %v414_v57  ;;  %v279_v20 = vmul.u32 384, %v278_v18 }
  0xb7   : > { %845 = vmatprep.subr.bf16.mxu1 %v3167_v7  ;;  %2890 = vmatprep.mubr.msk.bf16.mxu0 %vm4287_vm0, %v3127_v55  ;;  %v289_v19 = vshrl.u32 %v3364_v17, 8 }
  0xb8   : > { %v486_v60 = vpop.permute.xlu0 %485  ;;  %v524_v63 = vpop.permute.xlu1 %523  ;;  %v280_v22 = vsub.s32 %v269_v12, %v279_v20 }
  0xb9   : > { %v490_v62 = vsel %vm487_vm3, %v3303_v25, %v486_v60  ;;  %v528_v0 = vsel %vm4291_vm4, %v522_v30, %v524_v63  ;;  %v290_v21 = vmul.u32 384, %v289_v19 }
  0xba   : > { %846 = vmatpush1.bf16.msra.mxu1 %v452_v59  ;;  %vm305_vm9 = vcmp.ne.s32.totalorder %v280_v22, 0  ;;  %vm308_vm10 = vcmp.lt.s32.totalorder %v280_v22, 0  ;;  %v314_v24 = vadd.s32 384, %v280_v22 }
  0xbb   : > { %847 = vmatprep.subr.bf16.mxu1 %v3167_v7  ;;  %v291_v23 = vsub.s32 %v270_v13, %v290_v21  ;;  %vm311_vm13 = vmand %vm308_vm10, %vm305_vm9 }
  0xbc   : > { %v585_v2 = vpop.permute.xlu0 %584  ;;  %v623_v4 = vpop.permute.xlu1 %622  ;;  %v317_v26 = vsel %vm311_vm13, %v314_v24, %v280_v22 }
  0xbd   : > { %v589_v3 = vsel %vm4290_vm5, %v583_v35, %v585_v2  ;;  %v627_v5 = vsel %vm4289_vm6, %v621_v40, %v623_v4  ;;  %vm306_vm11 = vcmp.ne.s32.totalorder %v291_v23, 0  ;;  %vm309_vm12 = vcmp.lt.s32.totalorder %v291_v23, 0 }
  0xbe   : > { %848 = vmatpush1.bf16.msra.mxu1 %v490_v62  ;;  %833 = vmatmul.mubr.bf16.gmra.mrb[4].mxu0 %v3129_v61  ;;  %v315_v25 = vadd.s32 384, %v291_v23  ;;  %vm312_vm14 = vmand %vm309_vm12, %vm306_vm11  ;;  %v321_v28 = vsub.s32 0, %v317_v26  ;;  %v3371_v35 = vmul.u32.u64.low 2863311531, %v271_v31  ;;  %v3372_v36 = vmul.u32.u64.high 2863311531, %v271_v31, %v3371_v35 }
  0xbf   : > { %849 = vmatprep.subr.bf16.mxu1 %v3167_v7  ;;  %vm320_vm10 = vcmp.lt.s32.totalorder %v317_v26, 0  ;;  %vm368_vm4 = vcmp.lt.s32.totalorder %v317_v26, 288 }
  0xc0   : > { %v661_v6 = vpop.permute.xlu0 %660  ;;  %v699_v9 = vpop.permute.xlu1 %698  ;;  %v318_v27 = vsel %vm312_vm14, %v315_v25, %v291_v23  ;;  %v2847_v30 = vmin.u32 %v321_v28, %v317_v26  ;;  %v300_v40 = vshrl.u32 %v3372_v36, 8 }
  0xc1   : > { %v665_v8 = vsel %vm4288_vm7, %v659_v45, %v661_v6  ;;  %v703_v10 = vsel %vm700_vm8, %v697_v50, %v699_v9  ;;  %v332_v29 = vsub.s32 0, %v318_v27  ;;  %vm331_vm11 = vcmp.lt.s32.totalorder %v318_v27, 0 }
  0xc2   : > { %850 = vmatpush1.bf16.msra.mxu1 %v528_v0  ;;  %v3368_v33 = vmul.u32.u64.low 3817748708, %v2847_v30  ;;  %v3369_v34 = vmul.u32.u64.high 3817748708, %v2847_v30, %v3368_v33  ;;  %v301_v43 = vmul.u32 384, %v300_v40 }
  0xc3   : > { %851 = vmatprep.subr.bf16.mxu1 %v3167_v7  ;;  %v2848_v32 = vmin.u32 %v332_v29, %v318_v27 }
  0xc4   : > { %v326_v39 = vshrl.u32 %v3369_v34, 4  ;;  %v302_v46 = vsub.s32 %v271_v31, %v301_v43 }
  0xc5   : > { %v3374_v37 = vmul.u32.u64.low 3817748708, %v2848_v32  ;;  %v3375_v38 = vmul.u32.u64.high 3817748708, %v2848_v32, %v3374_v37 }
  0xc6   : > { %852 = vmatpush1.bf16.msra.mxu1 %v3126_v1  ;;  %v327_v42 = vmul.u32 18, %v326_v39  ;;  %vm307_vm15 = vcmp.ne.s32.totalorder %v302_v46, 0  ;;  %vm310_vm9 = vcmp.lt.s32.totalorder %v302_v46, 0  ;;  %v316_v50 = vadd.s32 384, %v302_v46 }
  0xc7   : > { %853 = vmatprep.subr.bf16.mxu1 %v3167_v7  ;;  %v337_v41 = vshrl.u32 %v3375_v38, 4  ;;  %vm313_vm12 = vmand %vm310_vm9, %vm307_vm15  ;;  %vm369_vm9 = vcmp.lt.s32.totalorder %v318_v27, 288 }
  0xc8   : > { %v328_v45 = vsub.s32 %v2847_v30, %v327_v42  ;;  %v3380_v53 = vsel %vm313_vm12, %v316_v50, %v302_v46 }
  0xc9   : > { %v338_v44 = vmul.u32 18, %v337_v41 }
  0xca   : > { %854 = vmatpush1.bf16.msra.mxu1 %v589_v3  ;;  %v329_v48 = vsub.s32 0, %v328_v45 }
  0xcb   : > { %855 = vmatprep.subr.bf16.mxu1 %v3167_v7  ;;  %v339_v47 = vsub.s32 %v2848_v32, %v338_v44 }
  0xcc   : > { %v330_v51 = vsel %vm320_vm10, %v329_v48, %v328_v45 }
  0xcd   : > { %v340_v49 = vsub.s32 0, %v339_v47  ;;  %vm353_vm13 = vcmp.ne.s32.totalorder %v330_v51, 0  ;;  %vm356_vm14 = vcmp.lt.s32.totalorder %v330_v51, 0 }
  0xce   : > { %856 = vmatpush1.bf16.msra.mxu1 %v627_v5  ;;  %vm359_vm6 = vmand %vm356_vm14, %vm353_vm13 }
  0xcf   : > { %857 = vmatprep.subr.bf16.mxu1 %v3167_v7  ;;  %v341_v52 = vsel %vm331_vm11, %v340_v49, %v339_v47 }
  0xd0   : > { %vm357_vm7 = vcmp.lt.s32.totalorder %v341_v52, 0  ;;  %v363_v56 = vadd.s32 18, %v341_v52 }
  0xd1   : > { %v3387_v62 = vpop.permute.xlu0 %747  ;;  %v3389_v0 = vpop.permute.xlu1 %752 }
  0xd2   : > { %858 = vmatpush1.bf16.msra.mxu1 %v665_v8 }
  0xd3   : > { %859 = vmatprep.subr.bf16.mxu1 %v3167_v7 }
  0xd5   : > { %v3408_v18 = vpop.permute.xlu1 %757  ;;  %v3420_v25 = vpop.permute.xlu0 %762 }
  0xd6   : > { %860 = vmatpush1.bf16.msra.mxu1 %v703_v10 }
  0xd9   : > { %876 = vmatmul.mubr.bf16.vlgmr.msra.gmra.mrb[0].mxu1 %v3123_v54  ;;  %v362_v54 = vadd.s32 18, %v330_v51 }
  0xda   : > { %2892 = vmatprep.mubr.msk.bf16.mxu1 %vm4287_vm0, %v3127_v55  ;;  %vm354_vm0 = vcmp.ne.s32.totalorder %v341_v52, 0  ;;  %v343_v55 = vsub.s32 0, %v3380_v53 }
  0xdb   : > { %vm360_vm5 = vmand %vm357_vm7, %vm354_vm0  ;;  %v365_v57 = vsel %vm359_vm6, %v362_v54, %v330_v51  ;;  %vm342_vm6 = vcmp.lt.s32.totalorder %v3380_v53, 0 }
  0xdc   : > { %v2849_v58 = vmin.u32 %v343_v55, %v3380_v53  ;;  %v366_v59 = vsel %vm360_vm5, %v363_v56, %v341_v52  ;;  %vm371_vm15 = vcmp.ge.s32.totalorder %v365_v57, 1  ;;  %vm377_vm12 = vcmp.le.s32.totalorder %v365_v57, 16 }
  0xdd   : > { %vm372_vm10 = vcmp.ge.s32.totalorder %v366_v59, 1  ;;  %vm374_vm11 = vmand %vm368_vm4, %vm371_vm15  ;;  %vm378_vm0 = vcmp.le.s32.totalorder %v366_v59, 16 }
  0xde   : > { %vm375_vm13 = vmand %vm369_vm9, %vm372_vm10  ;;  %vm370_vm9 = vcmp.lt.s32.totalorder %v3380_v53, 288 }
  0xdf   : > { %vm3392_vm5 = vmand %vm374_vm11, %vm377_vm12 }
  0xe0   : > { %vm3398_vm4 = vmand %vm375_vm13, %vm378_vm0 }
  0xe1   : > { %884 = vmatmul.mubr.bf16.gmra.mrb[4].mxu1 %v3129_v61  ;;  %v3384_v60 = vmul.u32.u64.low 3817748708, %v2849_v58  ;;  %v3385_v61 = vmul.u32.u64.high 3817748708, %v2849_v58, %v3384_v60 }
  0xe2   : > { %1496 = vmatprep.mubr.bf16.mxu1 %v3167_v7 }
  0xe3   : > { %v348_v15 = vshrl.u32 %v3385_v61, 4 }
  0xe5   : > { %v349_v29 = vmul.u32 18, %v348_v15 }
  0xe7   : > { %v350_v39 = vsub.s32 %v2849_v58, %v349_v29  ;;  %v1585_v29 = vld [vmem:[%s4284_s3 + $0x20] sm:$0x3f] }
  0xe9   : > { %v351_v48 = vsub.s32 0, %v350_v39 }
  0xeb   : > { %v352_v49 = vsel %vm342_vm6, %v351_v48, %v350_v39  ;;  %vm1419_vm6 = vcmask 261120  }
  0xec   : > { %vm355_vm7 = vcmp.ne.s32.totalorder %v352_v49, 0  ;;  %vm358_vm14 = vcmp.lt.s32.totalorder %v352_v49, 0  ;;  %v364_v50 = vadd.s32 18, %v352_v49 }
  0xed   : > { %vm361_vm15 = vmand %vm358_vm14, %vm355_vm7  ;;  %vm4302_vm7 = vcmask 7168  }
  0xee   : > { %v367_v51 = vsel %vm361_vm15, %v364_v50, %v352_v49  ;;  %vm4303_vm14 = vmmov %vm4302_vm7 }
  0xef   : > { %vm373_vm10 = vcmp.ge.s32.totalorder %v367_v51, 1  ;;  %vm379_vm12 = vcmp.le.s32.totalorder %v367_v51, 16  ;;  %vm4304_vm15 = vmmov %vm4302_vm7 }
  0xf0   : > { %vm376_vm11 = vmand %vm370_vm9, %vm373_vm10 }
  0xf1   : > { %vm3464_vm13 = vmand %vm376_vm11, %vm379_vm12  ;;  %vm4310_vm12 = vcmask 1039360  }
  0xf2   : > { %vm3638_vm0 = vmpackc.low %vm3464_vm13, %vm3464_vm13 }
  0xf3   : > { %vm3681_vm9 = vmpackc.low %vm3398_vm4, %vm3398_vm4 }
  0xf4   : > { %vm4307_vm10 = vmmov %vm4302_vm7 }
  0xf5   : > { %vm3693_vm11 = vmpackc.low %vm3392_vm5, %vm3392_vm5 }
 0x189   : > { %v824_v63 = vpop.f32.mrb[0].mxu0 }
 0x18a   : > { %v826_v1 = vpop.f32.mrb[1].mxu0  ;;  %v825_v2 = vadd.f32 %v824_v63, %v3387_v62 }
 0x18b   : > { %v828_v4 = vpop.f32.mrb[2].mxu0  ;;  %v827_v5 = vadd.f32 %v826_v1, %v3387_v62 }
 0x18c   : > { %v892_v6 = vmax.f32 %v825_v2, 0.0  ;;  %v829_v8 = vadd.f32 %v828_v4, %v3389_v0  ;;  %v830_v10 = vpop.f32.mrb[3].mxu0 }
 0x18d   : > { %v831_v11 = vadd.f32 %v830_v10, %v3389_v0  ;;  %v893_v12 = vmax.f32 %v827_v5, 0.0 }
 0x18e   : > { %v910_v13 = vsel %vm3392_vm5, %v892_v6, 0.0  ;;  %v895_v14 = vmax.f32 %v829_v8, 0.0 }
 0x18f   : > { %v896_v16 = vmax.f32 %v831_v11, 0.0  ;;  %v911_v17 = vsel %vm3398_vm4, %v893_v12, 0.0 }
 0x190   : > { %v913_v19 = vsel %vm3392_vm5, %v895_v14, 0.0  ;;  %v3412_v20 = vpack.c.bf16 %v895_v14, %v892_v6 }
 0x191   : > { %v3414_v21 = vpack.c.bf16 %v913_v19, %v910_v13  ;;  %v914_v22 = vsel %vm3398_vm4, %v896_v16, 0.0  ;;  %v3418_v23 = vpack.c.bf16 %v896_v16, %v893_v12  ;;  %v834_v24 = vpop.f32.mrb[4].mxu0  ;;  %v3053_v16 = vpop.permute.xlu1 %3052 }
 0x192   : > { %v3422_v26 = vpack.c.bf16 %v914_v22, %v911_v17  ;;  %v836_v27 = vpop.f32.mrb[5].mxu0  ;;  %v835_v28 = vadd.f32 %v834_v24, %v3408_v18  ;;  %v3055_v51 = vunpack.i.h.bf16 %v3053_v16 }
 0x193   : > { %952 = vrot.lane.b32.xlu1 %v3414_v21, %s3160_s24  ;;  %v838_v30 = vpop.f32.mrb[6].mxu0  ;;  %v837_v31 = vadd.f32 %v836_v27, %v3408_v18  ;;  %v3058_v27 = vpop.permute.xlu0 %3057 }
 0x194   : > { %v839_v32 = vadd.f32 %v838_v30, %v3420_v25  ;;  %v898_v33 = vmax.f32 %v835_v28, 0.0  ;;  %v840_v34 = vpop.f32.mrb[7].mxu0 }
 0x195   : > { %v841_v35 = vadd.f32 %v840_v34, %v3420_v25  ;;  %v899_v36 = vmax.f32 %v837_v31, 0.0  ;;  %v3546_v17 = vpop.permute.xlu1 %3062 }
 0x196   : > { %v901_v37 = vmax.f32 %v839_v32, 0.0  ;;  %v916_v38 = vsel %vm3392_vm5, %v898_v33, 0.0 }
 0x197   : > { %1052 = vrot.lane.b32.xlu1 %v3414_v21, %s3162_s26  ;;  %v902_v40 = vmax.f32 %v841_v35, 0.0  ;;  %v917_v41 = vsel %vm3398_vm4, %v899_v36, 0.0  ;;  %v3583_v31 = vpop.permute.xlu0 %3067 }
 0x198   : > { %v919_v42 = vsel %vm3392_vm5, %v901_v37, 0.0  ;;  %v3438_v43 = vpack.c.bf16 %v901_v37, %v898_v33 }
 0x199   : > { %v3440_v44 = vpack.c.bf16 %v919_v42, %v916_v38  ;;  %v920_v45 = vsel %vm3398_vm4, %v902_v40, 0.0  ;;  %v3444_v46 = vpack.c.bf16 %v902_v40, %v899_v36 }
 0x19a   : > { %v3446_v47 = vpack.c.bf16 %v920_v45, %v917_v41  ;;  %v3054_v41 = vunpack.i.l.bf16 %v3053_v16  ;;  %v3648_v16 = vld [vmem:[%s4283_s2 + $0x38] ss:$12 sps:$4 sm:$0xff]  }
 0x19b   : > { %1312 = vrot.lane.b32.xlu1 %v3414_v21, %s3168_s8 }
 0x19f   : > { %1004 = vrot.lane.b32.xlu1 %v3422_v26, %s3161_s25 }
 0x1a3   : > { %1104 = vrot.lane.b32.xlu1 %v3422_v26, %s3163_s27 }
 0x1a7   : > { %1314 = vrot.lane.b32.xlu1 %v3422_v26, %s3168_s8 }
 0x1ab   : > { %1010 = vrot.lane.b32.xlu1 %v3440_v44, %s3161_s25 }
 0x1ac   : > { %v877_v52 = vpop.f32.mrb[0].mxu1 }
 0x1ad   : > { %v878_v54 = vadd.f32 %v877_v52, %v3387_v62  ;;  %v879_v55 = vpop.f32.mrb[1].mxu1 }
 0x1ae   : > { %v880_v56 = vpop.f32.mrb[2].mxu1 }
 0x1af   : > { %v894_v57 = vmax.f32 %v878_v54, 0.0  ;;  %v881_v58 = vadd.f32 %v880_v56, %v3389_v0  ;;  %v882_v59 = vpop.f32.mrb[3].mxu1  ;;  %1110 = vrot.lane.b32.xlu1 %v3440_v44, %s3163_s27 }
 0x1b1   : > { %v897_v60 = vmax.f32 %v881_v58, 0.0  ;;  %v912_v61 = vsel %vm3464_vm13, %v894_v57, 0.0  ;;  %v3059_v58 = vunpack.i.l.bf16 %v3058_v27 }
 0x1b3   : > { %v915_v62 = vsel %vm3464_vm13, %v897_v60, 0.0  ;;  %v3472_v63 = vpack.c.bf16 %v897_v60, %v894_v57  ;;  %962 = vrot.lane.b32.xlu1 %v3446_v47, %s3160_s24 }
 0x1b4   : > { %v924_v0 = vpack.c.bf16 %v915_v62, %v912_v61  ;;  %v885_v1 = vpop.f32.mrb[4].mxu1 }
 0x1b5   : > { %v886_v2 = vadd.f32 %v885_v1, %v3408_v18  ;;  %v887_v4 = vpop.f32.mrb[5].mxu1  ;;  %v3553_v18 = vld [vmem:[%s4283_s2 + $0x34] ss:$12 sps:$4 sm:$0xff]  }
 0x1b6   : > { %v888_v5 = vpop.f32.mrb[6].mxu1  ;;  %1316 = vrot.lane.b32.xlu0 %v924_v0, %s3168_s8  ;;  %1455 = vmatprep.mubr.bf16.mxu0 %v3553_v18  ;;  %v3064_v4 = vunpack.i.l.bf16 %v3546_v17 }
 0x1b7   : > { %v900_v6 = vmax.f32 %v886_v2, 0.0  ;;  %v889_v8 = vadd.f32 %v888_v5, %v3420_v25  ;;  %1166 = vrot.lane.b32.xlu1 %v924_v0, %s3164_s28  ;;  %v890_v10 = vpop.f32.mrb[7].mxu1 }
 0x1b9   : > { %v903_v11 = vmax.f32 %v889_v8, 0.0  ;;  %v918_v12 = vsel %vm3464_vm13, %v900_v6, 0.0 }
 0x1ba   : > { %1002 = vrot.lane.b32.xlu0 %v3414_v21, %s3161_s25 }
 0x1bb   : > { %v921_v13 = vsel %vm3464_vm13, %v903_v11, 0.0  ;;  %v3486_v14 = vpack.c.bf16 %v903_v11, %v900_v6  ;;  %1320 = vrot.lane.b32.xlu1 %v3440_v44, %s3168_s8 }
 0x1bc   : > { %v927_v15 = vpack.c.bf16 %v921_v13, %v918_v12 }
 0x1be   : > { %1102 = vrot.lane.b32.xlu0 %v3414_v21, %s3163_s27 }
 0x1bf   : > { %1174 = vrot.lane.b32.xlu1 %v927_v15, %s3164_s28 }
 0x1c2   : > { %954 = vrot.lane.b32.xlu0 %v3422_v26, %s3160_s24 }
 0x1c3   : > { %1062 = vrot.lane.b32.xlu1 %v3446_v47, %s3162_s26 }
 0x1c6   : > { %1054 = vrot.lane.b32.xlu0 %v3422_v26, %s3162_s26 }
 0x1c7   : > { %956 = vrot.lane.b32.xlu1 %v924_v0, %s3160_s24 }
 0x1ca   : > { %1164 = vrot.lane.b32.xlu0 %v3422_v26, %s3164_s28 }
 0x1cb   : > { %1216 = vrot.lane.b32.xlu1 %v924_v0, %s3165_s29 }
 0x1ce   : > { %960 = vrot.lane.b32.xlu0 %v3440_v44, %s3160_s24 }
 0x1cf   : > { %964 = vrot.lane.b32.xlu1 %v927_v15, %s3160_s24 }
 0x1d2   : > { %1060 = vrot.lane.b32.xlu0 %v3440_v44, %s3162_s26 }
 0x1d3   : > { %1224 = vrot.lane.b32.xlu1 %v927_v15, %s3165_s29 }
 0x1d6   : > { %1162 = vrot.lane.b32.xlu0 %v3414_v21, %s3164_s28 }
 0x1d7   : > { %1322 = vrot.lane.b32.xlu1 %v3446_v47, %s3168_s8 }
 0x1da   : > { %1012 = vrot.lane.b32.xlu0 %v3446_v47, %s3161_s25 }
 0x1db   : > { %1220 = vrot.lane.b32.xlu1 %v3440_v44, %s3165_s29 }
 0x1de   : > { %1324 = vrot.lane.b32.xlu0 %v927_v15, %s3168_s8 }
 0x1df   : > { %1264 = vrot.lane.b32.xlu1 %v3422_v26, %s3166_s7 }
 0x1e2   : > { %1170 = vrot.lane.b32.xlu0 %v3440_v44, %s3164_s28 }
 0x1e3   : > { %1262 = vrot.lane.b32.xlu1 %v3414_v21, %s3166_s7 }
 0x1e6   : > { %1214 = vrot.lane.b32.xlu0 %v3422_v26, %s3165_s29 }
 0x1e7   : > { %1218 = vrot.lane.b32.xlu1 %v3167_v7, %s3165_s29 }
 0x1ea   : > { %1112 = vrot.lane.b32.xlu0 %v3446_v47, %s3163_s27 }
 0x1eb   : > { %1272 = vrot.lane.b32.xlu1 %v3446_v47, %s3166_s7 }
 0x1ee   : > { %1212 = vrot.lane.b32.xlu0 %v3414_v21, %s3165_s29 }
 0x1ef   : > { %1056 = vrot.lane.b32.xlu1 %v924_v0, %s3162_s26 }
 0x1f2   : > { %3072 = vrot.lane.b32.xlu0 %v3167_v7, %s3164_s28 }
 0x1f3   : > { %1064 = vrot.lane.b32.xlu1 %v927_v15, %s3162_s26 }
 0x1f6   : > { %1006 = vrot.lane.b32.xlu0 %v924_v0, %s3161_s25 }
 0x1f7   : > { %1106 = vrot.lane.b32.xlu1 %v924_v0, %s3163_s27 }
 0x1fa   : > { %1172 = vrot.lane.b32.xlu0 %v3446_v47, %s3164_s28 }
 0x1fb   : > { %1114 = vrot.lane.b32.xlu1 %v927_v15, %s3163_s27 }
 0x1fe   : > { %1266 = vrot.lane.b32.xlu0 %v924_v0, %s3166_s7  ;;  %v3060_v0 = vunpack.i.h.bf16 %v3058_v27 }
 0x1ff   : > { %1326 = vrot.lane.b32.xlu1 %v3167_v7, %s3168_s8 }
 0x202   : > { %1222 = vrot.lane.b32.xlu0 %v3446_v47, %s3165_s29 }
 0x203   : > { %1658 = vrot.lane.b32.xlu1 %v3167_v7, %s3160_s24 }
 0x205   : > { %v953_v19 = vpop.permute.xlu1 %952 }
 0x206   : > { %1014 = vrot.lane.b32.xlu0 %v927_v15, %s3161_s25  ;;  %v966_v47 = vsel %vm4292_vm1, %v3054_v41, %v953_v19 }
 0x207   : > { %1708 = vrot.lane.b32.xlu1 %v3167_v7, %s3162_s26 }
 0x209   : > { %v3561_v21 = vpop.permute.xlu1 %1052 }
 0x20a   : > { %1274 = vrot.lane.b32.xlu0 %v927_v15, %s3166_s7  ;;  %v1066_v13 = vsel %vm487_vm3, %v3064_v4, %v3561_v21 }
 0x20d   : > { %v1313_v22 = vpop.permute.xlu1 %1312 }
 0x20e   : > { %1270 = vrot.lane.b32.xlu0 %v3440_v44, %s3166_s7 }
 0x211   : > { %v3566_v24 = vpop.permute.xlu1 %1004 }
 0x212   : > { %1226 = vrot.lane.b32.xlu0 %v3167_v7, %s3165_s29 }
 0x215   : > { %v3570_v25 = vpop.permute.xlu1 %1104 }
 0x216   : > { %1268 = vrot.lane.b32.xlu0 %v3167_v7, %s3166_s7 }
 0x219   : > { %v1315_v26 = vpop.permute.xlu1 %1314 }
 0x21a   : > { %1276 = vrot.lane.b32.xlu0 %v3167_v7, %s3166_s7  ;;  %v1328_v36 = vsel %vm700_vm8, %v1313_v22, %v1315_v26  ;;  %v3065_v22 = vunpack.i.h.bf16 %v3546_v17  ;;  %v3069_v17 = vunpack.i.l.bf16 %v3583_v31 }
 0x21d   : > { %v1011_v28 = vpop.permute.xlu1 %1010 }
 0x21e   : > { %1318 = vrot.lane.b32.xlu0 %v3167_v7, %s3168_s8  ;;  %v1019_v5 = vsel %vm449_vm2, %v3060_v0, %v1011_v28 }
 0x221   : > { %v3581_v30 = vpop.permute.xlu1 %1110 }
 0x222   : > { %1588 = vperm.xlu0 %3049, %v1585_v29  }
 0x225   : > { %v3585_v32 = vpop.permute.xlu1 %962 }
 0x226   : > { %1683 = vrot.lane.b32.xlu0 %v3167_v7, %s3161_s25 }
 0x228   : > { %v3589_v33 = vpop.permute.xlu0 %1316 }
 0x229   : > { %v3591_v34 = vpop.permute.xlu1 %1166  ;;  %v1329_v35 = vsel %vm700_vm8, %v1315_v26, %v3589_v33 }
 0x22a   : > { %1464 = vmatprep.subr.bf16.mxu1 %v1329_v35  ;;  %1733 = vrot.lane.b32.xlu0 %v3167_v7, %s3163_s27 }
 0x22b   : > { %1465 = vmatpush1.bf16.msra.mxu1 %v1328_v36 }
 0x22c   : > { %v1003_v37 = vpop.permute.xlu0 %1002 }
 0x22d   : > { %v1321_v38 = vpop.permute.xlu1 %1320  ;;  %v1017_v57 = vsel %vm449_vm2, %v1003_v37, %v3566_v24  ;;  %v1016_v60 = vsel %vm449_vm2, %v3059_v58, %v1003_v37 }
 0x230   : > { %v3598_v39 = vpop.permute.xlu0 %1102 }
 0x231   : > { %v3600_v40 = vpop.permute.xlu1 %1174  ;;  %v1116_v36 = vsel %vm4303_vm14, %v3069_v17, %v3598_v39 }
 0x234   : > { %v955_v42 = vpop.permute.xlu0 %954 }
 0x235   : > { %v3602_v44 = vpop.permute.xlu1 %1062  ;;  %v967_v45 = vsel %vm4292_vm1, %v953_v19, %v955_v42 }
 0x236   : > { %1423 = vmatprep.subr.bf16.mxu0 %v967_v45 }
 0x237   : > { %1424 = vmatpush1.bf16.msra.mxu0 %v966_v47 }
 0x238   : > { %v3606_v48 = vpop.permute.xlu0 %1054 }
 0x239   : > { %v957_v7 = vpop.permute.xlu1 %956  ;;  %v1067_v8 = vsel %vm487_vm3, %v3561_v21, %v3606_v48 }
 0x23a   : > { %v968_v21 = vsel %vm4292_vm1, %v955_v42, %v957_v7 }
 0x23c   : > { %v3608_v49 = vpop.permute.xlu0 %1164 }
 0x23d   : > { %v3610_v50 = vpop.permute.xlu1 %1216  ;;  %v1179_v47 = vsel %vm4310_vm12, %v3608_v49, %v3591_v34 }
 0x240   : > { %v961_v52 = vpop.permute.xlu0 %960 }
 0x241   : > { %v970_v54 = vsel %vm4292_vm1, %v961_v52, %v3585_v32  ;;  %v969_v55 = vsel %vm4292_vm1, %v3055_v51, %v961_v52  ;;  %v965_v56 = vpop.permute.xlu1 %964 }
 0x242   : > { %1425 = vmatprep.subr.bf16.mxu0 %v970_v54  ;;  %v971_v35 = vsel %vm4292_vm1, %v3585_v32, %v965_v56 }
 0x243   : > { %1426 = vmatpush1.bf16.msra.mxu0 %v969_v55 }
 0x244   : > { %v1061_v59 = vpop.permute.xlu0 %1060  ;;  %1427 = vmatprep.subr.bf16.mxu0 %v1017_v57 }
 0x245   : > { %v3620_v62 = vpop.permute.xlu1 %1224  ;;  %v1070_v19 = vsel %vm487_vm3, %v1061_v59, %v3602_v44  ;;  %v1069_v27 = vsel %vm487_vm3, %v3065_v22, %v1061_v59 }
 0x247   : > { %1428 = vmatpush1.bf16.msra.mxu0 %v1016_v60 }
 0x248   : > { %v3618_v61 = vpop.permute.xlu0 %1162 }
 0x249   : > { %v1323_v6 = vpop.permute.xlu1 %1322 }
 0x24a   : > { %v1331_v15 = vsel %vm700_vm8, %v1321_v38, %v1323_v6 }
 0x24c   : > { %v3622_v1 = vpop.permute.xlu0 %1012 }
 0x24d   : > { %v1020_v2 = vsel %vm449_vm2, %v1011_v28, %v3622_v1  ;;  %v1117_v28 = vsel %vm4302_vm7, %v3598_v39, %v3570_v25  ;;  %v1221_v37 = vpop.permute.xlu1 %1220  ;;  %vm4311_vm7 = vmmov %vm4310_vm12 }
 0x24e   : > { %1429 = vmatprep.subr.bf16.mxu0 %v1020_v2  ;;  %vm4312_vm14 = vmmov %vm4311_vm7 }
 0x24f   : > { %1430 = vmatpush1.bf16.msra.mxu0 %v1019_v5  ;;  %v1178_v51 = vsel %vm4312_vm14, %v3618_v61, %v3608_v49  ;;  %vm4315_vm12 = vmmov %vm4311_vm7 }
 0x250   : > { %v3631_v10 = vpop.permute.xlu0 %1324  ;;  %1431 = vmatprep.subr.bf16.mxu0 %v1067_v8 }
 0x251   : > { %v1332_v11 = vsel %vm700_vm8, %v1323_v6, %v3631_v10  ;;  %v1265_v39 = vpop.permute.xlu1 %1264 }
 0x252   : > { %1466 = vmatprep.subr.bf16.mxu1 %v1332_v11 }
 0x253   : > { %1432 = vmatpush1.bf16.msra.mxu0 %v1066_v13  ;;  %1467 = vmatpush1.bf16.msra.mxu1 %v1331_v15 }
 0x254   : > { %v1171_v26 = vpop.permute.xlu0 %1170  ;;  %1433 = vmatprep.subr.bf16.mxu0 %v1070_v19  ;;  %2949 = vmatprep.subr.msk.bf16.mxu1 %vm3638_vm0, %v3472_v63  ;;  %v3070_v63 = vunpack.i.h.bf16 %v3583_v31  ;;  %v3131_v19 = vld [vmem:[%s4283_s2 + $0x30] ss:$12 sps:$4 sm:$0xff]  }
 0x256   : > { %2896 = vmatmul.mubr.msk.bf16.vlgmr.msra.gmra.mrb[8].mxu1 %vm1419_vm6, %v3648_v16 }
 0x257   : > { %1434 = vmatpush1.bf16.msra.mxu0 %v1069_v27  ;;  %2950 = vmatpush3.bf16.msra.mxu1 %v968_v21 }
 0x258   : > { %v1215_v29 = vpop.permute.xlu0 %1214  ;;  %1435 = vmatprep.subr.bf16.mxu0 %v1117_v28  ;;  %2951 = vmatprep.subr.msk.bf16.mxu1 %vm3638_vm0, %v3486_v14 }
 0x259   : > { %1537 = vmatprep.mubr.bf16.mxu1 %v3553_v18  ;;  %v1119_v18 = vsel %vm4307_vm10, %v3070_v63, %v3581_v30  ;;  %vm4314_vm10 = vmmov %vm4311_vm7 }
 0x25b   : > { %1436 = vmatpush1.bf16.msra.mxu0 %v1116_v36  ;;  %2952 = vmatpush3.bf16.msra.mxu1 %v971_v35  ;;  %v3169_v36 = vmov 0.0  }
 0x25c   : > { %v3673_v38 = vpop.permute.xlu0 %1112 }
 0x25d   : > { %v1120_v41 = vsel %vm4304_vm15, %v3581_v30, %v3673_v38  ;;  %vm4313_vm15 = vmmov %vm4311_vm7 }
 0x25e   : > { %1437 = vmatprep.subr.bf16.mxu0 %v1120_v41 }
 0x25f   : > { %1438 = vmatpush1.bf16.msra.mxu0 %v1119_v18 }
 0x260   : > { %v1213_v31 = vpop.permute.xlu0 %1212  ;;  %2915 = vmatprep.subr.msk.bf16.mxu0 %vm3681_vm9, %v3418_v23  ;;  %v1263_v23 = vpop.permute.xlu1 %1262 }
 0x263   : > { %2918 = vmatpush1.bf16.msk.msra.mxu0 %vm3693_vm11, %v3412_v20 }
 0x264   : > { %v3073_v42 = vpop.permute.xlu0 %3072  ;;  %2921 = vmatprep.subr.msk.bf16.mxu0 %vm3681_vm9, %v3444_v46  ;;  %v1219_v54 = vpop.permute.xlu1 %1218 }
 0x265   : > { %v3074_v30 = vunpack.i.l.bf16 %v3073_v42  ;;  %v3075_v45 = vunpack.i.h.bf16 %v3073_v42 }
 0x267   : > { %2924 = vmatpush1.bf16.msk.msra.mxu0 %vm3693_vm11, %v3438_v43  ;;  %v1180_v7 = vsel %vm4311_vm7, %v3591_v34, %v3074_v30  ;;  %v1183_v43 = vsel %vm4313_vm15, %v3600_v40, %v3075_v45  ;;  %vm4316_vm7 = vcmask 908288  }
 0x268   : > { %v1007_v20 = vpop.permute.xlu0 %1006  ;;  %1443 = vmatprep.subr.bf16.mxu0 %v1179_v47  ;;  %2953 = vmatprep.subr.bf16.mxu1 %v1180_v7  ;;  %vm4317_vm14 = vmmov %vm4316_vm7  ;;  %v1273_v57 = vpop.permute.xlu1 %1272 }
 0x269   : > { %v1018_v46 = vsel %vm449_vm2, %v3566_v24, %v1007_v20  ;;  %v1229_v24 = vsel %vm4316_vm7, %v1215_v29, %v3610_v50  ;;  %v1228_v49 = vsel %vm4317_vm14, %v1213_v31, %v1215_v29  ;;  %vm4318_vm15 = vmmov %vm4316_vm7 }
 0x26a   : > { %2954 = vmatpush3.bf16.msra.mxu1 %v1018_v46  ;;  %vm4319_vm1 = vmmov %vm4316_vm7 }
 0x26b   : > { %1444 = vmatpush1.bf16.msra.mxu0 %v1178_v51  ;;  %2955 = vmatprep.subr.bf16.mxu1 %v1183_v43  ;;  %vm4322_vm7 = vmmov %vm4319_vm1 }
 0x26c   : > { %v1173_v52 = vpop.permute.xlu0 %1172  ;;  %v1057_v0 = vpop.permute.xlu1 %1056  ;;  %v1230_v5 = vsel %vm4322_vm7, %v3610_v50, %v1219_v54  ;;  %v3740_v50 = vld [vmem:[#allocation3] sm:$0xff] }
 0x26d   : > { %v1182_v34 = vsel %vm4314_vm10, %v1173_v52, %v3600_v40  ;;  %v1181_v55 = vsel %vm4315_vm12, %v1171_v26, %v1173_v52  ;;  %vm4320_vm10 = vcmask 900096   ;;  %v1068_v8 = vsel %vm487_vm3, %v3606_v48, %v1057_v0  ;;  %v1606_v52 = vld [vmem:[%s3777_s23] sm:$0x77] }
 0x26e   : > { %1445 = vmatprep.subr.bf16.mxu0 %v1182_v34  ;;  %vm4321_vm12 = vmmov %vm4320_vm10  ;;  %v1610_v54 = vcombine.high %v1606_v52, %v1606_v52 }
 0x26f   : > { %1446 = vmatpush1.bf16.msra.mxu0 %v1181_v55  ;;  %v1278_v4 = vsel %vm4321_vm12, %v1263_v23, %v1265_v39  ;;  %vm4327_vm12 = vcmask 7168  }
 0x270   : > { %v1267_v56 = vpop.permute.xlu0 %1266  ;;  %1447 = vmatprep.subr.bf16.mxu0 %v1229_v24  ;;  %v1065_v13 = vpop.permute.xlu1 %1064 }
 0x271   : > { %v1279_v40 = vsel %vm4320_vm10, %v1265_v39, %v1267_v56  ;;  %v1071_v21 = vsel %vm487_vm3, %v3602_v44, %v1065_v13 }
 0x273   : > { %1448 = vmatpush1.bf16.msra.mxu0 %v1228_v49  ;;  %v1611_v49 = vrot.slane %v1606_v52, 5 }
 0x274   : > { %v1223_v58 = vpop.permute.xlu0 %1222  ;;  %v1107_v26 = vpop.permute.xlu1 %1106 }
 0x275   : > { %v1232_v59 = vsel %vm4318_vm15, %v1223_v58, %v3620_v62  ;;  %v1231_v60 = vsel %vm4319_vm1, %v1221_v37, %v1223_v58  ;;  %vm4323_vm1 = vmmov %vm4320_vm10  ;;  %v1118_v17 = vsel %vm4327_vm12, %v3570_v25, %v1107_v26  ;;  %v1612_v58 = vrot.slane %v1610_v54, 5  ;;  %v1641_v26 = vld [vmem:[#allocation3 + $0x8] sm:$0x3] }
 0x276   : > { %1449 = vmatprep.subr.bf16.mxu0 %v1232_v59  ;;  %vm4324_vm14 = vmmov %vm4323_vm1 }
 0x277   : > { %1450 = vmatpush1.bf16.msra.mxu0 %v1231_v60  ;;  %vm4325_vm15 = vmmov %vm4322_vm7 }
 0x278   : > { %v1015_v61 = vpop.permute.xlu0 %1014  ;;  %1451 = vmatprep.subr.bf16.mxu0 %v1279_v40  ;;  %vm4326_vm10 = vmmov %vm4323_vm1  ;;  %v1115_v29 = vpop.permute.xlu1 %1114 }
 0x279   : > { %v1021_v2 = vsel %vm449_vm2, %v3622_v1, %v1015_v61  ;;  %vm4328_vm7 = vmmov %vm4323_vm1 }
 0x27a   : > { %2956 = vmatpush3.bf16.msra.mxu1 %v1021_v2 }
 0x27b   : > { %1452 = vmatpush1.bf16.msra.mxu0 %v1278_v4  ;;  %2957 = vmatprep.subr.bf16.mxu1 %v1230_v5 }
 0x27c   : > { %v1275_v6 = vpop.permute.xlu0 %1274  ;;  %v1327_v25 = vpop.permute.xlu1 %1326 }
 0x27d   : > { %v1282_v11 = vsel %vm4323_vm1, %v1273_v57, %v1275_v6  ;;  %vm4329_vm1 = vmmov %vm4327_vm12 }
 0x27e   : > { %1453 = vmatprep.subr.bf16.mxu0 %v1282_v11  ;;  %2958 = vmatpush3.bf16.msra.mxu1 %v1068_v8 }
 0x280   : > { %v1271_v15 = vpop.permute.xlu0 %1270 }
 0x281   : > { %v1281_v1 = vsel %vm4324_vm14, %v1271_v15, %v1273_v57  ;;  %vm4293_vm14 = vmmov 0  }
 0x282   : > { %1454 = vmatpush1.bf16.msra.mxu0 %v1281_v1 }
 0x283   : > { %1988 = vmatprep.subr.bf16.mxu0 %v3740_v50 }
 0x284   : > { %v1227_v22 = vpop.permute.xlu0 %1226 }
 0x285   : > { %1456 = vmatmul.mubr.bf16.vlgmr.msra.gmra.mrb[8].mxu0 %v3131_v19  ;;  %v1233_v48 = vsel %vm4325_vm15, %v3620_v62, %v1227_v22  ;;  %v1121_v62 = vsel %vm4329_vm1, %v3673_v38, %v1115_v29  ;;  %v1333_v38 = vsel %vm700_vm8, %v3631_v10, %v1327_v25  ;;  %vm1638_vm15 = vcmask 1041408  }
 0x286   : > { %2959 = vmatprep.subr.bf16.mxu1 %v1233_v48 }
 0x287   : > { %2960 = vmatpush3.bf16.msra.mxu1 %v1071_v21 }
 0x288   : > { %v1269_v27 = vpop.permute.xlu0 %1268 }
 0x289   : > { %v1280_v28 = vsel %vm4326_vm10, %v1267_v56, %v1269_v27  ;;  %vm1639_vm10 = vsmask.f32 1280 }
 0x28a   : > { %2961 = vmatprep.subr.bf16.mxu1 %v1280_v28  ;;  %vm3782_vm12 = vmand %vm1638_vm15, %vm1639_vm10  ;;  %v1644_v28 = vld [vmem:[#allocation3 + $0x10] sm:$0x3]  ;;  %vm4334_vm15 = vcmask 154624  }
 0x28b   : > { %2962 = vmatpush3.bf16.msra.mxu1 %v1118_v17  ;;  %vm4335_vm10 = vmmov %vm4334_vm15 }
 0x28c   : > { %v1277_v63 = vpop.permute.xlu0 %1276 }
 0x28d   : > { %v1283_v35 = vsel %vm4328_vm7, %v1275_v6, %v1277_v63  ;;  %vm4332_vm7 = vcmask 130048  }
 0x28e   : > { %2963 = vmatprep.subr.bf16.mxu1 %v1283_v35  ;;  %vm4333_vm1 = vmmov %vm4332_vm7 }
 0x28f   : > { %2964 = vmatpush3.bf16.msra.mxu1 %v1121_v62  ;;  %v1607_v62 = vld [vmem:[%s3777_s23 + $0x8] sm:$0x7] }
 0x290   : > { %v1319_v44 = vpop.permute.xlu0 %1318  ;;  %2999 = vmatprep.subr.bf16.mxu1 %v3169_v36 }
 0x291   : > { %v1330_v37 = vsel %vm700_vm8, %v3589_v33, %v1319_v44  ;;  %v1613_v44 = vrot.slane %v1607_v62, 5 }
 0x292   : > { %1538 = vmatmul.mubr.bf16.vlgmr.msra.gmra.mrb[12].mxu1 %v3131_v19 }
 0x293   : > { %3000 = vmatpush3.bf16.msra.mxu1 %v1330_v37  ;;  %3003 = vmatprep.mubr.msk.bf16.mxu1 %vm4293_vm14, %v3169_v36 }
 0x294   : > { %3001 = vmatprep.subr.bf16.mxu1 %v3169_v36 }
 0x297   : > { %3002 = vmatpush3.bf16.msra.mxu1 %v1333_v38 }
 0x29a   : > { %3004 = vmatmul.mubr.msk.bf16.vlgmr.msra.gmra.mrb[16].mxu1 %vm1419_vm6, %v3648_v16 }
 0x2a1   : > { %v1589_v45 = vpop.permute.xlu0 %1588 }
 0x329   : > { %v1498_v41 = vpop.f32.mrb[8].mxu1 }
 0x32a   : > { %v1500_v18 = vpop.f32.mrb[9].mxu1 }
 0x32b   : > { %v1502_v33 = vpop.f32.mrb[10].mxu1 }
 0x32c   : > { %v1503_v31 = vpop.f32.mrb[11].mxu1 }
 0x358   : > { %v1457_v39 = vpop.f32.mrb[8].mxu0 }
 0x359   : > { %v1499_v42 = vadd.f32 %v1498_v41, %v1457_v39  ;;  %v1459_v30 = vpop.f32.mrb[9].mxu0  ;;  %v1647_v39 = vld [vmem:[#allocation3 + $0x18] sm:$0x3] }
 0x35a   : > { %v1501_v10 = vadd.f32 %v1500_v18, %v1459_v30  ;;  %v1461_v23 = vpop.f32.mrb[10].mxu0 }
 0x35b   : > { %v1591_v16 = vadd.f32 %v1589_v45, %v1499_v42  ;;  %v1462_v47 = vpop.f32.mrb[11].mxu0  ;;  %v1888_v23 = vld [vmem:[%s4284_s3 + $0x38] sm:$0xff] }
 0x35c   : > { %v1592_v7 = vadd.f32 %v1589_v45, %v1501_v10  ;;  %v3135_v10 = vld [vmem:[%s4283_s2 + $0x4c] ss:$12 sps:$4 sm:$0xff]  }
 0x35d   : > { %1594 = vst [vmem:[%s3767_s21] sm:$0x3f] %v1591_v16  ;;  %v1597_v20 = vmul.f32 0.5, %v1591_v16  ;;  %2902 = vmatprep.mubr.msk.bf16.mxu1 %vm4332_vm7, %v3135_v10  ;;  %2904 = vmatprep.mubr.msk.bf16.mxu0 %vm4333_vm1, %v3135_v10  ;;  %v1890_v47 = vld [vmem:[%s4284_s3 + $0x48] sm:$0xff]  ;;  %vm4337_vm7 = vcmask 7168  }
 0x35e   : > { %1595 = vst [vmem:[%s3767_s21 + $0x8] sm:$0x3f] %v1592_v7  ;;  %v1598_v46 = vmul.f32 0.5, %v1592_v7  ;;  %vm4338_vm1 = vmmov %vm4337_vm7 }
 0x35f   : > { %v1600_v51 = vmul.f32 1.442695, %v1597_v20  ;;  %v3879_v20 = vpack.i.bf16 %v3740_v50, %v3740_v50 }
 0x360   : > { %v1602_v43 = vmul.f32 1.442695, %v1598_v46  ;;  %v1684_v46 = vpop.permute.xlu0 %1683 }
 0x361   : > { %3145 = vpow2.f32 %v1600_v51 }
 0x362   : > { %3147 = vpow2.f32 %v1602_v43  ;;  %v1659_v43 = vpop.permute.xlu1 %1658 }
 0x364   : > { %v1734_v51 = vpop.permute.xlu0 %1733 }
 0x365   : > { %v2965_v34 = vpop.f32.mrb[12].mxu1 }
 0x366   : > { %v2966_v55 = vpop.f32.mrb[13].mxu1  ;;  %v1709_v54 = vpop.permute.xlu1 %1708 }
 0x367   : > { %v2967_v24 = vadd.f32 %v2966_v55, %v2965_v34  ;;  %v2968_v56 = vpop.f32.mrb[14].mxu1 }
 0x368   : > { %v2969_v57 = vpop.f32.mrb[15].mxu1 }
 0x36b   : > { %v3146_v59 = vpop.eup %3145 }
 0x36c   : > { %v3148_v60 = vpop.eup %3147  ;;  %v1617_v40 = vmul.f32 %v3146_v59, %v1611_v49 }
 0x36d   : > { %v1618_v61 = vmul.f32 %v3148_v60, %v1612_v58  ;;  %v1579_v0 = vpop.f32.mrb[16].mxu1 }
 0x36e   : > { %v1623_v2 = vrot.slane %v1617_v40, 3  ;;  %v1580_v4 = vadd.f32 %v2967_v24, %v1579_v0  ;;  %v3005_v5 = vpop.f32.mrb[17].mxu1 }
 0x36f   : > { %v1624_v6 = vrot.slane %v1618_v61, 3  ;;  %v1582_v8 = vpop.f32.mrb[18].mxu1 }
 0x370   : > { %v1629_v11 = vadd.f32 %v1623_v2, %v1591_v16  ;;  %v1593_v13 = vadd.f32 %v1589_v45, %v1580_v4  ;;  %v3006_v15 = vpop.f32.mrb[19].mxu1  ;;  %v1887_v16 = vld [vmem:[%s4284_s3 + $0x30] sm:$0xff] }
 0x371   : > { %v1630_v1 = vadd.f32 %v1624_v6, %v1592_v7  ;;  %v1889_v7 = vld [vmem:[%s4284_s3 + $0x40] sm:$0xff] }
 0x372   : > { %v1632_v19 = vsel %vm3392_vm5, %v1629_v11, 0.0  ;;  %1596 = vst [vmem:[%s3767_s21 + $0x10] sm:$0x3f] %v1593_v13  ;;  %v1599_v48 = vmul.f32 0.5, %v1593_v13 }
 0x373   : > { %v1635_v21 = vpack.c.bf16 %v1632_v19, %v1632_v19  ;;  %v1633_v27 = vsel %vm3398_vm4, %v1630_v1, 0.0 }
 0x374   : > { %v1636_v17 = vpack.c.bf16 %v1633_v27, %v1633_v27  ;;  %v1604_v29 = vmul.f32 1.442695, %v1599_v48 }
 0x375   : > { %v1642_v63 = vsel %vm3782_vm12, %v1635_v21, %v1641_v26 }
 0x376   : > { %1643 = vst [vmem:[#allocation3 + $0x8] sm:$0x3] %v1642_v63  ;;  %v1645_v35 = vsel %vm3782_vm12, %v1636_v17, %v1644_v28  ;;  %3149 = vpow2.f32 %v1604_v29 }
 0x377   : > { %1646 = vst [vmem:[#allocation3 + $0x10] sm:$0x3] %v1645_v35 }
 0x37d   : > { %v3794_v37 = vld [vmem:[#allocation3 + $0x8] sm:$0xff] }
 0x37e   : > { %1685 = vrot.lane.b32.xlu0 %v3794_v37, %s3161_s25  ;;  %1660 = vrot.lane.b32.xlu1 %v3794_v37, %s3160_s24  ;;  %v3804_v33 = vld [vmem:[#allocation3 + $0x10] sm:$0xff] }
 0x380   : > { %v3150_v25 = vpop.eup %3149 }
 0x381   : > { %v1619_v38 = vmul.f32 %v3150_v25, %v1613_v44 }
 0x382   : > { %1735 = vrot.lane.b32.xlu0 %v3794_v37, %s3163_s27  ;;  %1710 = vrot.lane.b32.xlu1 %v3794_v37, %s3162_s26 }
 0x383   : > { %v1625_v41 = vrot.slane %v1619_v38, 3 }
 0x385   : > { %v1631_v18 = vadd.f32 %v1625_v41, %v1593_v13 }
 0x386   : > { %1662 = vrot.lane.b32.xlu0 %v3804_v33, %s3160_s24 }
 0x387   : > { %v1634_v31 = vsel %vm3464_vm13, %v1631_v18, 0.0 }
 0x388   : > { %v1637_v42 = vpack.c.bf16 %v1634_v31, %v1634_v31 }
 0x38a   : > { %v1648_v30 = vsel %vm3782_vm12, %v1637_v42, %v1647_v39  ;;  %vm4336_vm12 = vmmov %vm4335_vm10  ;;  %v3137_v39 = vld [vmem:[%s4283_s2 + $0x48] ss:$12 sps:$4 sm:$0xff]   ;;  %v3138_v42 = vld [vmem:[%s4283_s2 + $0x64] ss:$12 sps:$4 sm:$0xff]  }
 0x38b   : > { %1649 = vst [vmem:[#allocation3 + $0x18] sm:$0x3] %v1648_v30 }
 0x392   : > { %v3812_v45 = vld [vmem:[#allocation3 + $0x18] sm:$0xff] }
 0x393   : > { %1664 = vrot.lane.b32.xlu1 %v3812_v45, %s3160_s24  ;;  %1768 = vrot.lane.b32.xlu0 %v3812_v45, %s3164_s28 }
 0x397   : > { %1687 = vrot.lane.b32.xlu1 %v3804_v33, %s3161_s25  ;;  %1712 = vrot.lane.b32.xlu0 %v3804_v33, %s3162_s26 }
 0x39b   : > { %1689 = vrot.lane.b32.xlu1 %v3812_v45, %s3161_s25  ;;  %1764 = vrot.lane.b32.xlu0 %v3794_v37, %s3164_s28 }
 0x39f   : > { %1737 = vrot.lane.b32.xlu1 %v3804_v33, %s3163_s27  ;;  %1793 = vrot.lane.b32.xlu0 %v3812_v45, %s3165_s29 }
 0x3a3   : > { %1714 = vrot.lane.b32.xlu1 %v3812_v45, %s3162_s26  ;;  %1789 = vrot.lane.b32.xlu0 %v3794_v37, %s3165_s29 }
 0x3a7   : > { %1766 = vrot.lane.b32.xlu1 %v3804_v33, %s3164_s28  ;;  %1818 = vrot.lane.b32.xlu0 %v3812_v45, %s3166_s7 }
 0x3ab   : > { %1791 = vrot.lane.b32.xlu1 %v3804_v33, %s3165_s29  ;;  %1814 = vrot.lane.b32.xlu0 %v3794_v37, %s3166_s7 }
 0x3af   : > { %1816 = vrot.lane.b32.xlu1 %v3804_v33, %s3166_s7  ;;  %1843 = vrot.lane.b32.xlu0 %v3812_v45, %s3168_s8 }
 0x3b3   : > { %1841 = vrot.lane.b32.xlu1 %v3804_v33, %s3168_s8  ;;  %1839 = vrot.lane.b32.xlu0 %v3794_v37, %s3168_s8 }
 0x3b7   : > { %1739 = vrot.lane.b32.xlu1 %v3812_v45, %s3163_s27  ;;  %1795 = vrot.lane.b32.xlu0 %v3740_v50, %s3165_s29 }
 0x3bb   : > { %1770 = vrot.lane.b32.xlu1 %v3740_v50, %s3164_s28  ;;  %1845 = vrot.lane.b32.xlu0 %v3740_v50, %s3168_s8 }
 0x3bf   : > { %1820 = vrot.lane.b32.xlu1 %v3740_v50, %s3166_s7  ;;  %1898 = vperm.xlu0 %3049, %v1888_v23  }
 0x3c3   : > { %1893 = vperm.xlu1 %3050, %v1887_v16   ;;  %1908 = vperm.xlu0 %3049, %v1890_v47   ;;  %v3140_v16 = vld [vmem:[%s4283_s2 + $0x60] ss:$12 sps:$4 sm:$0xff]  }
 0x3c7   : > { %1903 = vperm.xlu1 %3050, %v1889_v7   ;;  %3082 = vrot.lane.b32.xlu0 %v3879_v20, %s3161_s25 }
 0x3cb   : > { %3077 = vrot.lane.b32.xlu1 %v3879_v20, %s3160_s24  ;;  %3092 = vrot.lane.b32.xlu0 %v3879_v20, %s3163_s27 }
 0x3cf   : > { %3087 = vrot.lane.b32.xlu1 %v3879_v20, %s3162_s26  ;;  %3097 = vrot.lane.b32.xlu0 %v3879_v20, %s3164_s28 }
 0x3f0   : > { %v1686_v52 = vpop.permute.xlu0 %1685  ;;  %v1661_v55 = vpop.permute.xlu1 %1660 }
 0x3f1   : > { %v1666_v49 = vsel %vm4335_vm10, %v1659_v43, %v1661_v55  ;;  %v1691_v2 = vsel %vm449_vm2, %v1684_v46, %v1686_v52 }
 0x3f4   : > { %v1736_v34 = vpop.permute.xlu0 %1735  ;;  %v1711_v57 = vpop.permute.xlu1 %1710 }
 0x3f5   : > { %v1716_v11 = vsel %vm487_vm3, %v1709_v54, %v1711_v57  ;;  %v1741_v19 = vsel %vm4338_vm1, %v1734_v51, %v1736_v34  ;;  %vm4343_vm1 = vcmask 900096  }
 0x3f6   : > { %vm4344_vm14 = vmmov %vm4343_vm1 }
 0x3f8   : > { %v1663_v24 = vpop.permute.xlu0 %1662 }
 0x3f9   : > { %v1667_v56 = vsel %vm4334_vm15, %v1661_v55, %v1663_v24  ;;  %vm4339_vm15 = vcmask 1039360  }
 0x3fa   : > { %1935 = vmatprep.subr.bf16.mxu1 %v1667_v56  ;;  %vm4340_vm10 = vmmov %vm4339_vm15 }
 0x3fb   : > { %1936 = vmatpush1.bf16.msra.mxu1 %v1666_v49 }
 0x405   : > { %v1665_v58 = vpop.permute.xlu1 %1664  ;;  %v3893_v59 = vpop.permute.xlu0 %1768 }
 0x406   : > { %v1668_v60 = vsel %vm4336_vm12, %v1663_v24, %v1665_v58  ;;  %vm4341_vm12 = vcmask 908288  }
 0x407   : > { %1989 = vmatpush1.bf16.msra.mxu0 %v1668_v60 }
 0x408   : > { %1990 = vmatprep.subr.bf16.mxu0 %v3740_v50 }
 0x409   : > { %v1688_v40 = vpop.permute.xlu1 %1687  ;;  %v1713_v61 = vpop.permute.xlu0 %1712 }
 0x40a   : > { %v1692_v0 = vsel %vm449_vm2, %v1686_v52, %v1688_v40  ;;  %v1717_v4 = vsel %vm487_vm3, %v1711_v57, %v1713_v61 }
 0x40b   : > { %1937 = vmatprep.subr.bf16.mxu1 %v1692_v0 }
 0x40c   : > { %1938 = vmatpush1.bf16.msra.mxu1 %v1691_v2 }
 0x40d   : > { %v1690_v5 = vpop.permute.xlu1 %1689  ;;  %1939 = vmatprep.subr.bf16.mxu1 %v1717_v4  ;;  %v1765_v6 = vpop.permute.xlu0 %1764 }
 0x40e   : > { %v1693_v8 = vsel %vm449_vm2, %v1688_v40, %v1690_v5 }
 0x40f   : > { %1991 = vmatpush1.bf16.msra.mxu0 %v1693_v8 }
 0x410   : > { %1940 = vmatpush1.bf16.msra.mxu1 %v1716_v11  ;;  %1992 = vmatprep.subr.bf16.mxu0 %v3740_v50 }
 0x411   : > { %v1738_v13 = vpop.permute.xlu1 %1737  ;;  %v1794_v15 = vpop.permute.xlu0 %1793 }
 0x412   : > { %v1742_v1 = vsel %vm4337_vm7, %v1736_v34, %v1738_v13  ;;  %vm4342_vm7 = vmmov %vm4341_vm12 }
 0x413   : > { %1941 = vmatprep.subr.bf16.mxu1 %v1742_v1 }
 0x414   : > { %1942 = vmatpush1.bf16.msra.mxu1 %v1741_v19 }
 0x415   : > { %v1715_v22 = vpop.permute.xlu1 %1714  ;;  %1943 = vmatprep.subr.bf16.mxu1 %v3804_v33  ;;  %v1790_v26 = vpop.permute.xlu0 %1789 }
 0x416   : > { %v1718_v48 = vsel %vm487_vm3, %v1713_v61, %v1715_v22 }
 0x417   : > { %1993 = vmatpush1.bf16.msra.mxu0 %v1718_v48 }
 0x418   : > { %1944 = vmatpush1.bf16.msra.mxu1 %v3794_v37  ;;  %1994 = vmatprep.subr.bf16.mxu0 %v3740_v50 }
 0x419   : > { %v1767_v21 = vpop.permute.xlu1 %1766  ;;  %v1819_v27 = vpop.permute.xlu0 %1818 }
 0x41a   : > { %v1772_v28 = vsel %vm4339_vm15, %v1765_v6, %v1767_v21  ;;  %v1773_v17 = vsel %vm4340_vm10, %v1767_v21, %v3893_v59  ;;  %vm4346_vm15 = vcmask 130048  }
 0x41b   : > { %1945 = vmatprep.subr.bf16.mxu1 %v1773_v17 }
 0x41c   : > { %1946 = vmatpush1.bf16.msra.mxu1 %v1772_v28 }
 0x41d   : > { %v1792_v29 = vpop.permute.xlu1 %1791  ;;  %v1815_v63 = vpop.permute.xlu0 %1814 }
 0x41e   : > { %v1797_v35 = vsel %vm4341_vm12, %v1790_v26, %v1792_v29  ;;  %v1798_v62 = vsel %vm4342_vm7, %v1792_v29, %v1794_v15  ;;  %vm4347_vm12 = vmmov %vm4342_vm7 }
 0x41f   : > { %1947 = vmatprep.subr.bf16.mxu1 %v1798_v62  ;;  %vm4348_vm7 = vmmov %vm4343_vm1 }
 0x420   : > { %1948 = vmatpush1.bf16.msra.mxu1 %v1797_v35 }
 0x421   : > { %v1817_v44 = vpop.permute.xlu1 %1816  ;;  %v1844_v37 = vpop.permute.xlu0 %1843 }
 0x422   : > { %v1822_v25 = vsel %vm4343_vm1, %v1815_v63, %v1817_v44  ;;  %v1823_v38 = vsel %vm4344_vm14, %v1817_v44, %v1819_v27  ;;  %vm4345_vm14 = vcmask 7168   ;;  %vm4349_vm1 = vmmov %vm4346_vm15 }
 0x423   : > { %1949 = vmatprep.subr.bf16.mxu1 %v1823_v38 }
 0x424   : > { %1950 = vmatpush1.bf16.msra.mxu1 %v1822_v25 }
 0x425   : > { %v1842_v41 = vpop.permute.xlu1 %1841  ;;  %v1840_v18 = vpop.permute.xlu0 %1839 }
 0x426   : > { %v1847_v33 = vsel %vm700_vm8, %v1840_v18, %v1842_v41  ;;  %v1848_v31 = vsel %vm700_vm8, %v1842_v41, %v1844_v37 }
 0x427   : > { %1951 = vmatprep.subr.bf16.mxu1 %v1848_v31 }
 0x428   : > { %1952 = vmatpush1.bf16.msra.mxu1 %v1847_v33 }
 0x429   : > { %v1740_v30 = vpop.permute.xlu1 %1739  ;;  %v1796_v7 = vpop.permute.xlu0 %1795 }
 0x42a   : > { %v1743_v10 = vsel %vm4345_vm14, %v1738_v13, %v1740_v30  ;;  %v1799_v46 = vsel %vm4347_vm12, %v1794_v15, %v1796_v7 }
 0x42b   : > { %1968 = vmatmul.mubr.bf16.vlgmr.msra.gmra.mrb[20].mxu1 %v3137_v39  ;;  %1995 = vmatpush1.bf16.msra.mxu0 %v1743_v10 }
 0x42c   : > { %1996 = vmatprep.subr.bf16.mxu0 %v3740_v50  ;;  %2903 = vmatprep.mubr.msk.bf16.mxu1 %vm4346_vm15, %v3138_v42  ;;  %vm4354_vm15 = vcmask 7168  }
 0x42d   : > { %v1771_v23 = vpop.permute.xlu1 %1770  ;;  %v1846_v43 = vpop.permute.xlu0 %1845 }
 0x42e   : > { %v1774_v47 = vsel %vm4340_vm10, %v3893_v59, %v1771_v23  ;;  %v1849_v52 = vsel %vm700_vm8, %v1844_v37, %v1846_v43  ;;  %vm4355_vm10 = vmmov %vm4354_vm15 }
 0x42f   : > { %1997 = vmatpush1.bf16.msra.mxu0 %v3812_v45 }
 0x430   : > { %1998 = vmatprep.subr.bf16.mxu0 %v3740_v50 }
 0x431   : > { %v1821_v51 = vpop.permute.xlu1 %1820 }
 0x432   : > { %v1824_v45 = vsel %vm4348_vm7, %v1819_v27, %v1821_v51  ;;  %vm4357_vm7 = vmmov %vm4355_vm10 }
 0x433   : > { %1978 = vmatmul.mubr.bf16.gmra.mrb[24].mxu1 %v3140_v16  ;;  %1999 = vmatpush1.bf16.msra.mxu0 %v1774_v47 }
 0x434   : > { %2000 = vmatprep.subr.bf16.mxu0 %v3740_v50 }
 0x437   : > { %2001 = vmatpush1.bf16.msra.mxu0 %v1799_v46 }
 0x438   : > { %2002 = vmatprep.subr.bf16.mxu0 %v3740_v50 }
 0x43b   : > { %2003 = vmatpush1.bf16.msra.mxu0 %v1824_v45 }
 0x43c   : > { %2004 = vmatprep.subr.bf16.mxu0 %v3740_v50 }
 0x43e   : > { %v1899_v56 = vpop.permute.xlu0 %1898 }
 0x43f   : > { %2005 = vmatpush1.bf16.msra.mxu0 %v1849_v52 }
 0x442   : > { %2021 = vmatmul.mubr.bf16.vlgmr.msra.gmra.mrb[12].mxu0 %v3137_v39  ;;  %v1894_v54 = vpop.permute.xlu1 %1893  ;;  %v1909_v21 = vpop.permute.xlu0 %1908 }
 0x443   : > { %2905 = vmatprep.mubr.msk.bf16.mxu0 %vm4349_vm1, %v3138_v42  ;;  %vm4358_vm1 = vmmov %vm4357_vm7 }
 0x446   : > { %v1904_v8 = vpop.permute.xlu1 %1903  ;;  %v4057_v53 = vpop.permute.xlu0 %3082 }
 0x44a   : > { %2029 = vmatmul.mubr.bf16.gmra.mrb[16].mxu0 %v3140_v16 }
 0x44b   : > { %2634 = vmatprep.mubr.bf16.mxu0 %v3740_v50 }
 0x4fe   : > { %v1969_v34 = vpop.f32.mrb[20].mxu1 }
 0x4ff   : > { %v1970_v55 = vadd.f32 %v1969_v34, %v1894_v54  ;;  %v1971_v24 = vpop.f32.mrb[21].mxu1 }
 0x500   : > { %v1972_v49 = vadd.f32 %v1971_v24, %v1894_v54  ;;  %v1973_v57 = vpop.f32.mrb[22].mxu1 }
 0x501   : > { %v2037_v58 = vmax.f32 %v1970_v55, 0.0  ;;  %v1974_v59 = vadd.f32 %v1973_v57, %v1899_v56  ;;  %v1975_v60 = vpop.f32.mrb[23].mxu1 }
 0x502   : > { %v2038_v40 = vmax.f32 %v1972_v49, 0.0  ;;  %v1976_v61 = vadd.f32 %v1975_v60, %v1899_v56 }
 0x503   : > { %v2040_v0 = vmax.f32 %v1974_v59, 0.0  ;;  %v2049_v4 = vsel %vm3392_vm5, %v2037_v58, 0.0 }
 0x504   : > { %v2041_v2 = vmax.f32 %v1976_v61, 0.0  ;;  %v2050_v11 = vsel %vm3398_vm4, %v2038_v40, 0.0  ;;  %v2723_v61 = vld [vmem:[%s4284_s3 + $0x50] sm:$0x7] }
 0x505   : > { %v2052_v5 = vsel %vm3392_vm5, %v2040_v0, 0.0  ;;  %v3946_v6 = vpack.c.bf16 %v2040_v0, %v2037_v58  ;;  %v4073_v0 = vld [vmem:[%s4283_s2 + $0x7c] ss:$12 sps:$4 sm:$0xff]  }
 0x506   : > { %v3950_v13 = vpack.c.bf16 %v2052_v5, %v2049_v4  ;;  %v2053_v15 = vsel %vm3398_vm4, %v2041_v2, 0.0  ;;  %v3954_v1 = vpack.c.bf16 %v2041_v2, %v2038_v40  ;;  %v1979_v19 = vpop.f32.mrb[24].mxu1  ;;  %2593 = vmatprep.mubr.bf16.mxu1 %v4073_v0 }
 0x507   : > { %v3956_v22 = vpack.c.bf16 %v2053_v15, %v2050_v11  ;;  %v1980_v26 = vadd.f32 %v1979_v19, %v1904_v8  ;;  %v1981_v48 = vpop.f32.mrb[25].mxu1  ;;  %v3078_v11 = vpop.permute.xlu1 %3077 }
 0x508   : > { %v1982_v27 = vadd.f32 %v1981_v48, %v1904_v8  ;;  %v1983_v28 = vpop.f32.mrb[26].mxu1  ;;  %2141 = vrot.lane.b32.xlu0 %v3950_v13, %s3161_s25 }
 0x509   : > { %v2043_v17 = vmax.f32 %v1980_v26, 0.0  ;;  %v1984_v29 = vadd.f32 %v1983_v28, %v1909_v21  ;;  %v1985_v63 = vpop.f32.mrb[27].mxu1 }
 0x50a   : > { %v2044_v35 = vmax.f32 %v1982_v27, 0.0  ;;  %v1986_v62 = vadd.f32 %v1985_v63, %v1909_v21  ;;  %v3079_v63 = vunpack.i.l.bf16 %v3078_v11 }
 0x50b   : > { %v2046_v44 = vmax.f32 %v1984_v29, 0.0  ;;  %v2055_v25 = vsel %vm3392_vm5, %v2043_v17, 0.0  ;;  %v4093_v19 = vpop.permute.xlu1 %3087 }
 0x50c   : > { %v2047_v37 = vmax.f32 %v1986_v62, 0.0  ;;  %2451 = vrot.lane.b32.xlu0 %v3950_v13, %s3168_s8  ;;  %v2056_v18 = vsel %vm3398_vm4, %v2044_v35, 0.0 }
 0x50d   : > { %v2058_v38 = vsel %vm3392_vm5, %v2046_v44, 0.0  ;;  %v3966_v41 = vpack.c.bf16 %v2046_v44, %v2043_v17  ;;  %vm4350_vm5 = vcmask 154624  }
 0x50e   : > { %v3970_v33 = vpack.c.bf16 %v2058_v38, %v2055_v25  ;;  %v2059_v31 = vsel %vm3398_vm4, %v2047_v37, 0.0  ;;  %v3974_v39 = vpack.c.bf16 %v2047_v37, %v2044_v35  ;;  %vm4351_vm4 = vmmov %vm4350_vm5 }
 0x50f   : > { %v3976_v42 = vpack.c.bf16 %v2059_v31, %v2056_v18  ;;  %vm4353_vm14 = vmmov %vm4351_vm4 }
 0x510   : > { %2093 = vrot.lane.b32.xlu0 %v3956_v22, %s3160_s24  ;;  %vm4356_vm12 = vmmov %vm4351_vm4 }
 0x514   : > { %2193 = vrot.lane.b32.xlu0 %v3956_v22, %s3162_s26 }
 0x515   : > { %v2022_v3 = vpop.f32.mrb[12].mxu0 }
 0x516   : > { %v2023_v30 = vadd.f32 %v2022_v3, %v1894_v54  ;;  %v2024_v10 = vpop.f32.mrb[13].mxu0 }
 0x517   : > { %v2025_v23 = vpop.f32.mrb[14].mxu0 }
 0x518   : > { %v2039_v16 = vmax.f32 %v2023_v30, 0.0  ;;  %v2026_v47 = vadd.f32 %v2025_v23, %v1899_v56  ;;  %2453 = vrot.lane.b32.xlu0 %v3956_v22, %s3168_s8  ;;  %v2027_v9 = vpop.f32.mrb[15].mxu0 }
 0x51a   : > { %v2042_v7 = vmax.f32 %v2026_v47, 0.0  ;;  %v2051_v46 = vsel %vm3464_vm13, %v2039_v16, 0.0 }
 0x51c   : > { %v2054_v51 = vsel %vm3464_vm13, %v2042_v7, 0.0  ;;  %v3988_v45 = vpack.c.bf16 %v2042_v7, %v2039_v16  ;;  %2243 = vrot.lane.b32.xlu0 %v3956_v22, %s3163_s27  ;;  %v3080_v16 = vunpack.i.h.bf16 %v3078_v11 }
 0x51d   : > { %v2063_v43 = vpack.c.bf16 %v2054_v51, %v2051_v46  ;;  %v2030_v52 = vpop.f32.mrb[16].mxu0  ;;  %v3084_v46 = vunpack.i.l.bf16 %v4057_v53 }
 0x51e   : > { %v2031_v54 = vadd.f32 %v2030_v52, %v1904_v8  ;;  %v2032_v34 = vpop.f32.mrb[17].mxu0 }
 0x51f   : > { %v2033_v55 = vpop.f32.mrb[18].mxu0  ;;  %2455 = vrot.lane.b32.xlu1 %v2063_v43, %s3168_s8 }
 0x520   : > { %v2045_v24 = vmax.f32 %v2031_v54, 0.0  ;;  %v2034_v56 = vadd.f32 %v2033_v55, %v1909_v21  ;;  %v2035_v49 = vpop.f32.mrb[19].mxu0 }
 0x522   : > { %v2048_v57 = vmax.f32 %v2034_v56, 0.0  ;;  %v2057_v58 = vsel %vm3464_vm13, %v2045_v24, 0.0 }
 0x523   : > { %2095 = vrot.lane.b32.xlu1 %v2063_v43, %s3160_s24 }
 0x524   : > { %v2060_v59 = vsel %vm3464_vm13, %v2048_v57, 0.0  ;;  %v3998_v60 = vpack.c.bf16 %v2048_v57, %v2045_v24  ;;  %vm4352_vm13 = vmmov %vm4351_vm4  ;;  %v3085_v24 = vunpack.i.h.bf16 %v4057_v53  ;;  %v3090_v53 = vunpack.i.h.bf16 %v4093_v19 }
 0x525   : > { %v2066_v40 = vpack.c.bf16 %v2060_v59, %v2057_v58  ;;  %v3089_v59 = vunpack.i.l.bf16 %v4093_v19 }
 0x527   : > { %2463 = vrot.lane.b32.xlu0 %v2066_v40, %s3168_s8  ;;  %2305 = vrot.lane.b32.xlu1 %v2063_v43, %s3164_s28 }
 0x52b   : > { %2103 = vrot.lane.b32.xlu0 %v2066_v40, %s3160_s24  ;;  %2145 = vrot.lane.b32.xlu1 %v2063_v43, %s3161_s25 }
 0x52f   : > { %2099 = vrot.lane.b32.xlu0 %v3970_v33, %s3160_s24  ;;  %2091 = vrot.lane.b32.xlu1 %v3950_v13, %s3160_s24 }
 0x533   : > { %2199 = vrot.lane.b32.xlu0 %v3970_v33, %s3162_s26  ;;  %2191 = vrot.lane.b32.xlu1 %v3950_v13, %s3162_s26 }
 0x537   : > { %2249 = vrot.lane.b32.xlu0 %v3970_v33, %s3163_s27  ;;  %2241 = vrot.lane.b32.xlu1 %v3950_v13, %s3163_s27 }
 0x53b   : > { %2151 = vrot.lane.b32.xlu0 %v3976_v42, %s3161_s25  ;;  %2143 = vrot.lane.b32.xlu1 %v3956_v22, %s3161_s25 }
 0x53f   : > { %2313 = vrot.lane.b32.xlu0 %v2066_v40, %s3164_s28  ;;  %2149 = vrot.lane.b32.xlu1 %v3970_v33, %s3161_s25 }
 0x543   : > { %2303 = vrot.lane.b32.xlu0 %v3956_v22, %s3164_s28  ;;  %2459 = vrot.lane.b32.xlu1 %v3970_v33, %s3168_s8 }
 0x547   : > { %2355 = vrot.lane.b32.xlu0 %v2063_v43, %s3165_s29  ;;  %2101 = vrot.lane.b32.xlu1 %v3976_v42, %s3160_s24 }
 0x54b   : > { %2195 = vrot.lane.b32.xlu0 %v2063_v43, %s3162_s26  ;;  %2153 = vrot.lane.b32.xlu1 %v2066_v40, %s3161_s25 }
 0x54f   : > { %2309 = vrot.lane.b32.xlu0 %v3970_v33, %s3164_s28  ;;  %2301 = vrot.lane.b32.xlu1 %v3950_v13, %s3164_s28 }
 0x553   : > { %2203 = vrot.lane.b32.xlu0 %v2066_v40, %s3162_s26  ;;  %3102 = vrot.lane.b32.xlu1 %v3879_v20, %s3165_s29 }
 0x557   : > { %2351 = vrot.lane.b32.xlu0 %v3950_v13, %s3165_s29  ;;  %2201 = vrot.lane.b32.xlu1 %v3976_v42, %s3162_s26 }
 0x55b   : > { %3107 = vrot.lane.b32.xlu0 %v3879_v20, %s3166_s7  ;;  %2461 = vrot.lane.b32.xlu1 %v3976_v42, %s3168_s8  ;;  %v4062_v20 = vpop.permute.xlu0 %3092 }
 0x55f   : > { %2413 = vrot.lane.b32.xlu0 %v2066_v40, %s3166_s7  ;;  %2363 = vrot.lane.b32.xlu1 %v2066_v40, %s3165_s29  ;;  %v4077_v2 = vpop.permute.xlu0 %3097 }
 0x563   : > { %2361 = vrot.lane.b32.xlu0 %v3976_v42, %s3165_s29  ;;  %2251 = vrot.lane.b32.xlu1 %v3976_v42, %s3163_s27 }
 0x567   : > { %2403 = vrot.lane.b32.xlu0 %v3956_v22, %s3166_s7  ;;  %2353 = vrot.lane.b32.xlu1 %v3956_v22, %s3165_s29 }
 0x56b   : > { %2411 = vrot.lane.b32.xlu0 %v3976_v42, %s3166_s7  ;;  %2405 = vrot.lane.b32.xlu1 %v2063_v43, %s3166_s7 }
 0x56f   : > { %2409 = vrot.lane.b32.xlu0 %v3970_v33, %s3166_s7  ;;  %2245 = vrot.lane.b32.xlu1 %v2063_v43, %s3163_s27 }
 0x573   : > { %2726 = vperm.xlu0 %3049, %v2723_v61   ;;  %2311 = vrot.lane.b32.xlu1 %v3976_v42, %s3164_s28 }
 0x577   : > { %2359 = vrot.lane.b32.xlu1 %v3970_v33, %s3165_s29 }
 0x57a   : > { %v2142_v4 = vpop.permute.xlu0 %2141 }
 0x57b   : > { %2253 = vrot.lane.b32.xlu1 %v2066_v40, %s3163_s27  ;;  %v2155_v34 = vsel %vm449_vm2, %v3084_v46, %v2142_v4 }
 0x57e   : > { %v2452_v5 = vpop.permute.xlu0 %2451 }
 0x57f   : > { %2401 = vrot.lane.b32.xlu1 %v3950_v13, %s3166_s7 }
 0x582   : > { %v4085_v8 = vpop.permute.xlu0 %2093 }
 0x583   : > { %2457 = vrot.lane.b32.xlu1 %v3740_v50, %s3168_s8 }
 0x586   : > { %v4091_v15 = vpop.permute.xlu0 %2193 }
 0x587   : > { %2465 = vrot.lane.b32.xlu1 %v3740_v50, %s3168_s8 }
 0x58a   : > { %v2454_v22 = vpop.permute.xlu0 %2453 }
 0x58b   : > { %v2467_v13 = vsel %vm700_vm8, %v2452_v5, %v2454_v22 }
 0x58e   : > { %v4100_v21 = vpop.permute.xlu0 %2243 }
 0x591   : > { %v4095_v26 = vpop.permute.xlu1 %2455 }
 0x592   : > { %v2468_v48 = vsel %vm700_vm8, %v2454_v22, %v4095_v26 }
 0x593   : > { %2602 = vmatprep.subr.bf16.mxu0 %v2468_v48 }
 0x594   : > { %2603 = vmatpush1.bf16.msra.mxu0 %v2467_v13  ;;  %v3094_v13 = vunpack.i.l.bf16 %v4062_v20 }
 0x595   : > { %v4102_v27 = vpop.permute.xlu1 %2095 }
 0x599   : > { %v4104_v28 = vpop.permute.xlu0 %2463  ;;  %v4106_v50 = vpop.permute.xlu1 %2305 }
 0x59d   : > { %v4108_v17 = vpop.permute.xlu0 %2103  ;;  %v4110_v29 = vpop.permute.xlu1 %2145 }
 0x5a1   : > { %v2100_v35 = vpop.permute.xlu0 %2099  ;;  %v2092_v62 = vpop.permute.xlu1 %2091 }
 0x5a2   : > { %v2105_v44 = vsel %vm4350_vm5, %v3079_v63, %v2092_v62  ;;  %v2106_v37 = vsel %vm4351_vm4, %v2092_v62, %v4085_v8  ;;  %v2108_v51 = vsel %vm4353_vm14, %v3080_v16, %v2100_v35  ;;  %vm4359_vm5 = vmmov %vm4351_vm4  ;;  %vm4363_vm14 = vcmask 908288  }
 0x5a3   : > { %2561 = vmatprep.subr.bf16.mxu1 %v2106_v37 }
 0x5a4   : > { %2562 = vmatpush1.bf16.msra.mxu1 %v2105_v44  ;;  %v4169_v44 = vld [vmem:[%s4283_s2 + $0x80] ss:$12 sps:$4 sm:$0xff]  }
 0x5a5   : > { %v2200_v25 = vpop.permute.xlu0 %2199  ;;  %v2192_v38 = vpop.permute.xlu1 %2191 }
 0x5a6   : > { %v2206_v58 = vsel %vm487_vm3, %v2192_v38, %v4091_v15  ;;  %v2205_v61 = vsel %vm487_vm3, %v3089_v59, %v2192_v38  ;;  %v2208_v22 = vsel %vm487_vm3, %v3090_v53, %v2200_v25  ;;  %v2107_v38 = vsel %vm4356_vm12, %v4085_v8, %v4102_v27 }
 0x5a7   : > { %vm4369_vm12 = vcmask 900096  }
 0x5a9   : > { %v4115_v18 = vpop.permute.xlu0 %2249  ;;  %v2242_v33 = vpop.permute.xlu1 %2241 }
 0x5aa   : > { %v2256_v48 = vsel %vm4354_vm15, %v2242_v33, %v4100_v21  ;;  %v2255_v62 = vsel %vm4355_vm10, %v3094_v13, %v2242_v33  ;;  %v3095_v33 = vunpack.i.h.bf16 %v4062_v20  ;;  %v3100_v20 = vunpack.i.h.bf16 %v4077_v2 }
 0x5ac   : > { %v2258_v27 = vsel %vm4358_vm1, %v3095_v33, %v4115_v18 }
 0x5ad   : > { %v4117_v31 = vpop.permute.xlu0 %2151  ;;  %v4119_v42 = vpop.permute.xlu1 %2143 }
 0x5ae   : > { %v2156_v43 = vsel %vm449_vm2, %v2142_v4, %v4119_v42 }
 0x5b1   : > { %v4121_v3 = vpop.permute.xlu0 %2313  ;;  %v2150_v30 = vpop.permute.xlu1 %2149 }
 0x5b2   : > { %v2159_v55 = vsel %vm449_vm2, %v2150_v30, %v4117_v31  ;;  %v2158_v49 = vsel %vm449_vm2, %v3085_v24, %v2150_v30 }
 0x5b5   : > { %v4123_v10 = vpop.permute.xlu0 %2303  ;;  %v2460_v23 = vpop.permute.xlu1 %2459 }
 0x5b9   : > { %v4125_v47 = vpop.permute.xlu0 %2355  ;;  %v2102_v9 = vpop.permute.xlu1 %2101 }
 0x5ba   : > { %v2109_v7 = vsel %vm4352_vm13, %v2100_v35, %v2102_v9 }
 0x5bb   : > { %2563 = vmatprep.subr.bf16.mxu1 %v2109_v7 }
 0x5bc   : > { %2564 = vmatpush1.bf16.msra.mxu1 %v2108_v51 }
 0x5bd   : > { %2565 = vmatprep.subr.bf16.mxu1 %v2156_v43  ;;  %v4132_v52 = vpop.permute.xlu1 %2153  ;;  %v4134_v54 = vpop.permute.xlu0 %2195 }
 0x5c0   : > { %2566 = vmatpush1.bf16.msra.mxu1 %v2155_v34 }
 0x5c1   : > { %2567 = vmatprep.subr.bf16.mxu1 %v2159_v55  ;;  %v4140_v56 = vpop.permute.xlu1 %2301  ;;  %v4143_v57 = vpop.permute.xlu0 %2309 }
 0x5c4   : > { %2568 = vmatpush1.bf16.msra.mxu1 %v2158_v49 }
 0x5c5   : > { %2569 = vmatprep.subr.bf16.mxu1 %v2206_v58  ;;  %v4148_v40 = vpop.permute.xlu1 %3102  ;;  %v4154_v5 = vpop.permute.xlu0 %2203 }
 0x5c8   : > { %2570 = vmatpush1.bf16.msra.mxu1 %v2205_v61 }
 0x5c9   : > { %v4152_v4 = vpop.permute.xlu1 %2201  ;;  %v4171_v37 = vpop.permute.xlu0 %2351 }
 0x5ca   : > { %v2209_v11 = vsel %vm487_vm3, %v2200_v25, %v4152_v4 }
 0x5cb   : > { %2571 = vmatprep.subr.bf16.mxu1 %v2209_v11 }
 0x5cc   : > { %2572 = vmatpush1.bf16.msra.mxu1 %v2208_v22 }
 0x5cd   : > { %2573 = vmatprep.subr.bf16.mxu1 %v2256_v48  ;;  %v2462_v63 = vpop.permute.xlu1 %2461 }
 0x5ce   : > { %v2470_v19 = vsel %vm700_vm8, %v2460_v23, %v2462_v63  ;;  %v2471_v35 = vsel %vm700_vm8, %v2462_v63, %v4104_v28  ;;  %v3108_v23 = vpop.permute.xlu0 %3107 }
 0x5cf   : > { %2604 = vmatprep.subr.bf16.mxu0 %v2471_v35 }
 0x5d0   : > { %2574 = vmatpush1.bf16.msra.mxu1 %v2255_v62  ;;  %2605 = vmatpush1.bf16.msra.mxu0 %v2470_v19 }
 0x5d1   : > { %2974 = vmatprep.subr.msk.bf16.mxu0 %vm3638_vm0, %v3988_v45  ;;  %v4176_v25 = vpop.permute.xlu1 %2363  ;;  %v3099_v45 = vunpack.i.l.bf16 %v4077_v2  ;;  %v2160_v2 = vsel %vm449_vm2, %v4117_v31, %v4132_v52  ;;  %v2207_v31 = vsel %vm487_vm3, %v4091_v15, %v4134_v54  ;;  %v2210_v15 = vsel %vm487_vm3, %v4152_v4, %v4154_v5 }
 0x5d2   : > { %v2414_v16 = vpop.permute.xlu0 %2413 }
 0x5d3   : > { %2909 = vmatmul.mubr.msk.bf16.vlgmr.msra.gmra.mrb[20].mxu0 %vm1419_vm6, %v4169_v44 }
 0x5d4   : > { %2975 = vmatpush3.bf16.msra.mxu0 %v2107_v38  ;;  %2675 = vmatprep.mubr.bf16.mxu0 %v4073_v0  ;;  %v2110_v0 = vsel %vm4359_vm5, %v2102_v9, %v4108_v17  ;;  %v3104_v17 = vunpack.i.l.bf16 %v4148_v40  ;;  %vm4372_vm5 = vmmov %vm4369_vm12 }
 0x5d5   : > { %2976 = vmatprep.subr.msk.bf16.mxu0 %vm3638_vm0, %v3998_v60  ;;  %v4188_v30 = vpop.permute.xlu1 %2251  ;;  %vm4360_vm0 = vcmask 1039360  }
 0x5d6   : > { %v2259_v8 = vsel %vm4357_vm7, %v4115_v18, %v4188_v30  ;;  %v2319_v12 = vsel %vm4360_vm0, %v4106_v50, %v3099_v45  ;;  %v2157_v18 = vsel %vm449_vm2, %v4119_v42, %v4110_v29  ;;  %vm4361_vm4 = vmmov %vm4360_vm0  ;;  %v2369_v29 = vsel %vm4363_vm14, %v4125_v47, %v3104_v17  ;;  %v2362_v42 = vpop.permute.xlu0 %2361 }
 0x5d7   : > { %2575 = vmatprep.subr.bf16.mxu1 %v2259_v8  ;;  %v2322_v9 = vsel %vm4361_vm4, %v4121_v3, %v3100_v20  ;;  %vm4362_vm13 = vmmov %vm4360_vm0 }
 0x5d8   : > { %2576 = vmatpush1.bf16.msra.mxu1 %v2258_v27  ;;  %2977 = vmatpush3.bf16.msra.mxu0 %v2110_v0  ;;  %vm4364_vm2 = vmmov %vm4360_vm0 }
 0x5d9   : > { %2933 = vmatprep.subr.msk.bf16.mxu1 %vm3681_vm9, %v3954_v1  ;;  %2978 = vmatprep.subr.bf16.mxu0 %v2319_v12  ;;  %v2354_v60 = vpop.permute.xlu1 %2353  ;;  %v2317_v32 = vsel %vm4364_vm2, %v4140_v56, %v4123_v10  ;;  %vm4367_vm15 = vmmov %vm4360_vm0 }
 0x5da   : > { %v2404_v43 = vpop.permute.xlu0 %2403  ;;  %vm4377_vm2 = vmmov %vm4372_vm5 }
 0x5dc   : > { %2936 = vmatpush1.bf16.msk.msra.mxu1 %vm3693_vm11, %v3946_v6  ;;  %2979 = vmatpush3.bf16.msra.mxu0 %v2157_v18  ;;  %v2318_v6 = vsel %vm4362_vm13, %v4123_v10, %v4106_v50  ;;  %v3110_v10 = vunpack.i.h.bf16 %v3108_v23  ;;  %vm4375_vm13 = vmmov %vm4372_vm5 }
 0x5dd   : > { %2939 = vmatprep.subr.msk.bf16.mxu1 %vm3681_vm9, %v3974_v39  ;;  %2980 = vmatprep.subr.bf16.mxu0 %v2322_v9  ;;  %v2406_v1 = vpop.permute.xlu1 %2405  ;;  %v3105_v39 = vunpack.i.h.bf16 %v4148_v40  ;;  %vm4365_vm9 = vmmov %vm4363_vm14 }
 0x5de   : > { %vm4368_vm10 = vmmov %vm4365_vm9  ;;  %v2422_v56 = vsel %vm4372_vm5, %v2414_v16, %v3110_v10  ;;  %v2412_v49 = vpop.permute.xlu0 %2411  ;;  %v2418_v59 = vsel %vm4375_vm13, %v2404_v43, %v2406_v1 }
 0x5df   : > { %v2372_v50 = vsel %vm4365_vm9, %v4176_v25, %v3105_v39  ;;  %v2368_v52 = vsel %vm4368_vm10, %v2354_v60, %v4125_v47  ;;  %vm4370_vm7 = vmmov %vm4365_vm9  ;;  %v2421_v4 = vsel %vm4377_vm2, %v2412_v49, %v2414_v16  ;;  %vm4378_vm9 = vmmov 0  }
 0x5e0   : > { %2942 = vmatpush1.bf16.msk.msra.mxu1 %vm3693_vm11, %v3966_v41  ;;  %2981 = vmatpush3.bf16.msra.mxu0 %v2160_v2  ;;  %v3109_v41 = vunpack.i.l.bf16 %v3108_v23  ;;  %vm4366_vm11 = vmmov %vm4360_vm0 }
 0x5e1   : > { %2581 = vmatprep.subr.bf16.mxu1 %v2318_v6  ;;  %v2246_v14 = vpop.permute.xlu1 %2245  ;;  %2982 = vmatprep.subr.bf16.mxu0 %v2369_v29  ;;  %vm4371_vm3 = vmmov %vm4370_vm7 }
 0x5e2   : > { %v2419_v54 = vsel %vm4369_vm12, %v2406_v1, %v3109_v41  ;;  %v2257_v55 = vsel %vm4358_vm1, %v4100_v21, %v2246_v14  ;;  %v2371_v24 = vsel %vm4371_vm3, %v2362_v42, %v4176_v25  ;;  %vm4373_vm0 = vmmov %vm4358_vm1  ;;  %v3142_v21 = vld [vmem:[%s4283_s2 + $0x78] ss:$12 sps:$4 sm:$0xff]   ;;  %v2410_v53 = vpop.permute.xlu0 %2409 }
 0x5e3   : > { %vm4374_vm4 = vmmov %vm4371_vm3 }
 0x5e4   : > { %2582 = vmatpush1.bf16.msra.mxu1 %v2317_v32  ;;  %2983 = vmatpush3.bf16.msra.mxu0 %v2207_v31  ;;  %vm4376_vm14 = vmmov %vm4372_vm5 }
 0x5e5   : > { %v2312_v7 = vpop.permute.xlu1 %2311  ;;  %2984 = vmatprep.subr.bf16.mxu0 %v2372_v50 }
 0x5e6   : > { %v2320_v46 = vsel %vm4366_vm11, %v4143_v57, %v2312_v7  ;;  %v2321_v51 = vsel %vm4367_vm15, %v2312_v7, %v4121_v3  ;;  %v2367_v3 = vsel %vm4370_vm7, %v4171_v37, %v2354_v60  ;;  %vm4379_vm11 = vmmov %vm4377_vm2 }
 0x5e7   : > { %2583 = vmatprep.subr.bf16.mxu1 %v2321_v51  ;;  %v2420_v22 = vsel %vm4379_vm11, %v2410_v53, %v2412_v49 }
 0x5e8   : > { %2584 = vmatpush1.bf16.msra.mxu1 %v2320_v46  ;;  %2985 = vmatpush3.bf16.msra.mxu0 %v2210_v15 }
 0x5e9   : > { %2585 = vmatprep.subr.bf16.mxu1 %v2368_v52  ;;  %v2360_v34 = vpop.permute.xlu1 %2359  ;;  %2986 = vmatprep.subr.bf16.mxu0 %v2419_v54 }
 0x5ea   : > { %v2370_v58 = vsel %vm4374_vm4, %v2360_v34, %v2362_v42 }
 0x5ec   : > { %2586 = vmatpush1.bf16.msra.mxu1 %v2367_v3  ;;  %2987 = vmatpush3.bf16.msra.mxu0 %v2257_v55 }
 0x5ed   : > { %2587 = vmatprep.subr.bf16.mxu1 %v2371_v24  ;;  %v2254_v47 = vpop.permute.xlu1 %2253  ;;  %2988 = vmatprep.subr.bf16.mxu0 %v2422_v56 }
 0x5ee   : > { %v2260_v57 = vsel %vm4373_vm0, %v4188_v30, %v2254_v47 }
 0x5f0   : > { %2588 = vmatpush1.bf16.msra.mxu1 %v2370_v58  ;;  %2989 = vmatpush3.bf16.msra.mxu0 %v2260_v57 }
 0x5f1   : > { %2589 = vmatprep.subr.bf16.mxu1 %v2418_v59  ;;  %v2402_v40 = vpop.permute.xlu1 %2401  ;;  %3007 = vmatprep.subr.bf16.mxu0 %v3169_v36 }
 0x5f2   : > { %v2417_v61 = vsel %vm4376_vm14, %v2402_v40, %v2404_v43  ;;  %v2727_v23 = vpop.permute.xlu0 %2726 }
 0x5f3   : > { %2676 = vmatmul.mubr.bf16.vlgmr.msra.gmra.mrb[24].mxu0 %v3142_v21 }
 0x5f4   : > { %2590 = vmatpush1.bf16.msra.mxu1 %v2417_v61  ;;  %3011 = vmatprep.mubr.msk.bf16.mxu0 %vm4378_vm9, %v3169_v36 }
 0x5f5   : > { %2591 = vmatprep.subr.bf16.mxu1 %v2421_v4  ;;  %v2458_v5 = vpop.permute.xlu1 %2457 }
 0x5f6   : > { %v2469_v11 = vsel %vm700_vm8, %v4095_v26, %v2458_v5 }
 0x5f7   : > { %3008 = vmatpush3.bf16.msra.mxu0 %v2469_v11 }
 0x5f8   : > { %2592 = vmatpush1.bf16.msra.mxu1 %v2420_v22  ;;  %3009 = vmatprep.subr.bf16.mxu0 %v3169_v36 }
 0x5f9   : > { %v2466_v48 = vpop.permute.xlu1 %2465 }
 0x5fa   : > { %v2472_v13 = vsel %vm700_vm8, %v4104_v28, %v2466_v48 }
 0x5fb   : > { %2594 = vmatmul.mubr.bf16.vlgmr.msra.gmra.mrb[28].mxu1 %v3142_v21  ;;  %3010 = vmatpush3.bf16.msra.mxu0 %v2472_v13 }
 0x5fe   : > { %3012 = vmatmul.mubr.msk.bf16.vlgmr.msra.gmra.mrb[28].mxu0 %vm1419_vm6, %v4169_v44 }
 0x6a6   : > { %v2636_v63 = vpop.f32.mrb[20].mxu0 }
 0x6a7   : > { %v2638_v19 = vpop.f32.mrb[21].mxu0 }
 0x6a8   : > { %v2640_v35 = vpop.f32.mrb[22].mxu0 }
 0x6a9   : > { %v2641_v62 = vpop.f32.mrb[23].mxu0 }
 0x6c6   : > { %v2990_v26 = vpop.f32.mrb[24].mxu0 }
 0x6c7   : > { %v2991_v37 = vpop.f32.mrb[25].mxu0 }
 0x6c8   : > { %v2992_v25 = vadd.f32 %v2991_v37, %v2990_v26  ;;  %v2993_v38 = vpop.f32.mrb[26].mxu0 }
 0x6c9   : > { %v2994_v33 = vpop.f32.mrb[27].mxu0 }
 0x6ce   : > { %v2595_v36 = vpop.f32.mrb[28].mxu1 }
 0x6cf   : > { %v2637_v30 = vadd.f32 %v2636_v63, %v2595_v36  ;;  %v2597_v45 = vpop.f32.mrb[29].mxu1 }
 0x6d0   : > { %v2639_v28 = vadd.f32 %v2638_v19, %v2597_v45  ;;  %v2599_v8 = vpop.f32.mrb[30].mxu1 }
 0x6d1   : > { %v2729_v27 = vadd.f32 %v2727_v23, %v2637_v30  ;;  %v2600_v0 = vpop.f32.mrb[31].mxu1  ;;  %v2717_v12 = vpop.f32.mrb[28].mxu0 }
 0x6d2   : > { %v2730_v44 = vadd.f32 %v2727_v23, %v2639_v28  ;;  %v2718_v60 = vadd.f32 %v2992_v25, %v2717_v12  ;;  %v3013_v20 = vpop.f32.mrb[29].mxu0 }
 0x6d3   : > { %v2720_v18 = vpop.f32.mrb[30].mxu0 }
 0x6d4   : > { %v2734_v17 = vcombine.low %v2729_v27, %v2730_v44  ;;  %v2731_v16 = vadd.f32 %v2727_v23, %v2718_v60  ;;  %v3014_v9 = vpop.f32.mrb[31].mxu0 }
 0x6d6   : > { %2736 = vst [vmem:[%s257_s13] sm:$0x77] %v2734_v17  ;;  %2737 = vst [vmem:[%s257_s13 + $0x8] sm:$0x7] %v2731_v16 }
 0x6d7 PF: > { %s16_s18 = sadd.s32 1, %s3158_s18  }
 0x6d8   : > { %p13_p4 = scmp.ge.s32.totalorder %s16_s18, 4  }
 0x6da   :  { %15 = sbr.rel (!%p13_p4) target bundleno = 1 (0x1), region = 81 }

</bundles_post_ra>
